<compile_context>
chip_gen: v6e
topology: v6e:2x2x1
jax: 0.10.0
libtpu: 0.0.40
codegen_flags: <defaults>
</compile_context>

<pallas_src>
import functools

import jax
import jax.numpy as jnp
from jax.experimental import pallas as pl
from jax.experimental.pallas import tpu as pltpu

# ----------------------------- configuration --------------------------------
B = 2        # real batch
BP = 8       # batch padded to the sublane count
T = 8        # time steps from transcription network
H = 16       # TN hidden == PN (GRU) hidden  (required by "sum" joint)
V = 8        # vocabulary size (classifier output dim)
BLANK = 0    # blank id
VM1 = V - 1  # one-hot embedding dim (blank excluded, as in speechbrain Embedding)
NEG_SLOPE = 0.01  # torch.nn.LeakyReLU default


# ------------------------------- kernel -------------------------------------
def _greedy_kernel(tn_ref,                 # (T, BP, H)  whole sequence in VMEM
                   wx_ref, bx_ref,         # (V, 3H), (1, 3H)  GRU input weights (emb folded)
                   wh_ref, bh_ref,         # (H, 3H), (1, 3H)  GRU hidden weights
                   wj_ref, bj_ref,         # (H, H),  (1, H)   joint Linear
                   wc_ref, bc_ref,         # (H, V),  (1, V)   classifier Linear
                   tok_out_ref,            # (BP, T) int32 output (emitted tokens per step)
                   score_ref):             # (BP, 1) f32   output (accumulated log-prob)
    H2 = 2 * H

    # hoisted iotas (reused by prologue + every unrolled step)
    lane_v = jax.lax.broadcasted_iota(jnp.int32, (BP, V), 1)
    lane_t = jax.lax.broadcasted_iota(jnp.int32, (BP, T), 1)

    def pn_forward(tok, h):
        # one-hot over full vocab; the blank row of the folded input weight is
        # zero, matching speechbrain's consider_as_one_hot embedding (blank_id=0).
        oh = (lane_v == tok).astype(jnp.float32)                     # (BP, V)
        gx = jnp.dot(oh, wx_ref[...],
                     preferred_element_type=jnp.float32) + bx_ref[...]   # (BP, 3H)
        gh = jnp.dot(h, wh_ref[...],
                     preferred_element_type=jnp.float32) + bh_ref[...]   # (BP, 3H)
        # torch GRU gate order: r, z, n ; n-gate hidden part multiplied by r.
        r = jax.nn.sigmoid(gx[:, 0:H] + gh[:, 0:H])
        z = jax.nn.sigmoid(gx[:, H:H2] + gh[:, H:H2])
        n = jnp.tanh(gx[:, H2:] + r * gh[:, H2:])
        return (1.0 - z) * n + z * h                                 # = out_PN = hidden

    # ---- prologue: token = blank, hidden = 0, out_PN = PN(blank, 0) ----
    tok0 = jnp.full((BP, 1), BLANK, jnp.int32)
    h0 = pn_forward(tok0, jnp.zeros((BP, H), jnp.float32))
    score0 = jnp.zeros((BP, 1), jnp.float32)
    tok_acc0 = jnp.full((BP, T), BLANK, jnp.int32)

    def body(t, carry):
        tok, hid, pn, score, tok_acc = carry

        # ---- joint ("sum") + classifier ----
        tn_t = tn_ref[t]                                             # (BP, H)
        joint = tn_t + pn
        jlin = jnp.dot(joint, wj_ref[...],
                       preferred_element_type=jnp.float32) + bj_ref[...]
        jact = jnp.where(jlin >= 0.0, jlin, NEG_SLOPE * jlin)        # LeakyReLU
        logits = jnp.dot(jact, wc_ref[...],
                         preferred_element_type=jnp.float32) + bc_ref[...]

        # ---- max / argmax of log_softmax without materializing log_softmax ----
        # argmax(log_softmax) == argmax(logits); max(log_softmax) = -log(sum exp(logits - m))
        m = jnp.max(logits, axis=-1, keepdims=True)                  # (BP, 1)
        s = jnp.sum(jnp.exp(logits - m), axis=-1, keepdims=True)
        max_lp = -jnp.log(s)                                         # (BP, 1)
        pos = jnp.min(jnp.where(logits == m, lane_v, V),
                      axis=-1, keepdims=True)                        # first occurrence, like torch.max

        # ---- greedy transducer update rule ----
        is_emit = pos != BLANK                                       # (BP, 1)
        emitted = jnp.where(is_emit, pos, BLANK).astype(jnp.int32)   # blank == no emission
        tok_acc = jnp.where(lane_t == t, emitted, tok_acc)           # column-t update (VPU select)
        score = score + jnp.where(is_emit, max_lp, 0.0)
        tok = jnp.where(is_emit, pos, tok).astype(jnp.int32)

        # PN step for emitting rows; non-emitting rows keep previous state
        h_new = pn_forward(tok, hid)
        hid = jnp.where(is_emit, h_new, hid)
        pn = jnp.where(is_emit, h_new, pn)
        return tok, hid, pn, score, tok_acc

    _, _, _, score, tok_acc = jax.lax.fori_loop(
        0, T, body, (tok0, h0, h0, score0, tok_acc0), unroll=True)

    # one bulk store per output, in the epilogue
    tok_out_ref[...] = tok_acc
    score_ref[...] = score


# ------------------------------ wrapper --------------------------------------
def transducer_greedy_decode(tn_output, params):
    """tn_output: [B, T, H]  ->  (per-step tokens [B, T], per-batch logp [B])."""
    b_in = tn_output.shape[0]
    tn_tm = jnp.transpose(tn_output, (1, 0, 2)).astype(jnp.float32)  # (T, B, H)
    tn_pad = jnp.zeros((T, BP, H), jnp.float32).at[:, :b_in, :].set(tn_tm)

    # host-side: fold the one-hot embedding into the GRU input weights
    wx = (params["emb"] @ params["wih"]).astype(jnp.float32)         # (V, 3H), blank row == 0

    vmem = functools.partial(pl.BlockSpec, memory_space=pltpu.MemorySpace.VMEM)
    tok_steps, scores = pl.pallas_call(
        _greedy_kernel,
        out_shape=[jax.ShapeDtypeStruct((BP, T), jnp.int32),
                   jax.ShapeDtypeStruct((BP, 1), jnp.float32)],
        in_specs=[vmem()] * 9,
        out_specs=[vmem(), vmem()],
        # NOTE: no grid -- the whole decode (time recurrence) runs in one invocation.
        # TODO(synk): for large real batches on v7x, add a leading batch grid axis
        # marked "parallel" to split work across the two TensorCores.
    )(tn_pad, wx, params["bih"], params["whh"], params["bhh"],
      params["wj"], params["bj"], params["wc"], params["bc"])
    return tok_steps[:b_in], scores[:b_in, 0]


def transducer_beam_searcher_forward(tn_output, params):
    """Mimics TransducerBeamSearcher.forward (greedy path) return structure:
    (predictions, exp(scores).mean(), None, None)."""
    tok_steps, scores = transducer_greedy_decode(tn_output, params)
    tok_np = jax.device_get(tok_steps)
    predictions = [[int(tok) for tok in tok_np[b] if int(tok) != BLANK]
                   for b in range(tok_np.shape[0])]
    final_score = jnp.mean(jnp.exp(scores))
    return predictions, final_score, None, None


# ------------------------- pure-JAX reference --------------------------------
def _reference(tn_output, p):
    def pn_forward(tok, h):
        oh = jax.nn.one_hot(tok[:, 0], V, dtype=jnp.float32)
        x = oh @ p["emb"]
        gi = x @ p["wih"] + p["bih"]
        gh = h @ p["whh"] + p["bhh"]
        r = jax.nn.sigmoid(gi[:, :H] + gh[:, :H])
        z = jax.nn.sigmoid(gi[:, H:2 * H] + gh[:, H:2 * H])
        n = jnp.tanh(gi[:, 2 * H:] + r * gh[:, 2 * H:])
        return (1.0 - z) * n + z * h

    tok = jnp.full((B, 1), BLANK, jnp.int32)
    h = pn_forward(tok, jnp.zeros((B, H), jnp.float32))
    out_pn = h
    scores = jnp.zeros((B,), jnp.float32)
    toks = []
    for t in range(T):
        joint = tn_output[:, t, :] + out_pn
        jlin = joint @ p["wj"] + p["bj"]
        jact = jnp.where(jlin >= 0, jlin, NEG_SLOPE * jlin)
        logits = jact @ p["wc"] + p["bc"]
        logp = jax.nn.log_softmax(logits, axis=-1)
        pos = jnp.argmax(logp, axis=-1)
        lp = jnp.max(logp, axis=-1)
        emit = pos != BLANK
        toks.append(jnp.where(emit, pos, BLANK).astype(jnp.int32))
        scores = scores + jnp.where(emit, lp, 0.0)
        tok = jnp.where(emit[:, None], pos[:, None].astype(jnp.int32), tok)
        h_new = pn_forward(tok, h)
        h = jnp.where(emit[:, None], h_new, h)
        out_pn = jnp.where(emit[:, None], h_new, out_pn)
    return jnp.stack(toks, axis=1), scores


# ------------------------------- main ----------------------------------------
def _make_params(key):
    ks = jax.random.split(key, 8)
    u = lambda k, shape, scale: jax.random.uniform(k, shape, jnp.float32, -scale, scale)
    # one-hot embedding (speechbrain consider_as_one_hot, blank row = zeros)
    emb = jnp.zeros((V, VM1), jnp.float32)
    emb = emb.at[1:, :].set(jnp.eye(VM1, dtype=jnp.float32))
    s_gru = 1.0 / jnp.sqrt(H)
    return {
        "emb": emb,
        "wih": u(ks[0], (VM1, 3 * H), s_gru),
        "whh": u(ks[1], (H, 3 * H), s_gru),
        "bih": u(ks[2], (1, 3 * H), s_gru),
        "bhh": u(ks[3], (1, 3 * H), s_gru),
        "wj": u(ks[4], (H, H), 1.0 / jnp.sqrt(H)),
        "bj": u(ks[5], (1, H), 1.0 / jnp.sqrt(H)),
        "wc": u(ks[6], (H, V), 1.0 / jnp.sqrt(H)),
        "bc": u(ks[7], (1, V), 1.0 / jnp.sqrt(H)),
    }


if __name__ == "__main__":
    key = jax.random.PRNGKey(0)
    k_tn, k_p = jax.random.split(key)
    tn_output = jax.random.normal(k_tn, (B, T, H), jnp.float32)  # [batch, time, hiddens]
    params = _make_params(k_p)

    preds, score, _, _ = transducer_beam_searcher_forward(tn_output, params)
    score = jax.block_until_ready(score)

    # correctness check against a pure-JAX reference of the greedy decoder
    tok_k, sc_k = transducer_greedy_decode(tn_output, params)
    tok_k, sc_k = jax.block_until_ready((tok_k, sc_k))
    tok_r, sc_r = _reference(tn_output, params)
    assert (jax.device_get(tok_k) == jax.device_get(tok_r)).all(), "token mismatch"
    assert jnp.allclose(sc_k, sc_r, atol=1e-4, rtol=1e-4), "score mismatch"

    print("KERNEL_OK")
</pallas_src>

<mosaic_0001>
module attributes {stable_mosaic.version = 11 : i64} {
  func.func @_greedy_kernel(%arg0: memref<8x8x16xf32, #tpu.memory_space<vmem>>, %arg1: memref<8x48xf32, #tpu.memory_space<vmem>>, %arg2: memref<1x48xf32, #tpu.memory_space<vmem>>, %arg3: memref<16x48xf32, #tpu.memory_space<vmem>>, %arg4: memref<1x48xf32, #tpu.memory_space<vmem>>, %arg5: memref<16x16xf32, #tpu.memory_space<vmem>>, %arg6: memref<1x16xf32, #tpu.memory_space<vmem>>, %arg7: memref<16x8xf32, #tpu.memory_space<vmem>>, %arg8: memref<1x8xf32, #tpu.memory_space<vmem>>, %arg9: memref<8x8xi32, #tpu.memory_space<vmem>>, %arg10: memref<8x1xf32, #tpu.memory_space<vmem>>) attributes {dimension_semantics = [], scalar_prefetch = 0 : i64, scratch_operands = 0 : i64, tpu.core_type = #tpu.core_type<tc>} {
    %0 = tpu.iota {dimensions = array<i32: 1>} : vector<8x8xi32>
    %1 = tpu.iota {dimensions = array<i32: 1>} : vector<8x8xi32>
    %c0_i32 = arith.constant 0 : i32
    %2 = vector.broadcast %c0_i32 : i32 to vector<8x1xi32>
    %cst = arith.constant 0.000000e+00 : f32
    %3 = vector.broadcast %cst : f32 to vector<8x16xf32>
    %4 = vector.broadcast %2 : vector<8x1xi32> to vector<8x8xi32>
    %5 = arith.cmpi eq, %0, %4 : vector<8x8xi32>
    %6 = arith.extui %5 : vector<8x8xi1> to vector<8x8xi32>
    %7 = arith.sitofp %6 : vector<8x8xi32> to vector<8x8xf32>
    %c0 = arith.constant 0 : index
    %c0_0 = arith.constant 0 : index
    %8 = vector.load %arg1[%c0, %c0_0] : memref<8x48xf32, #tpu.memory_space<vmem>>, vector<8x48xf32>
    %cst_1 = arith.constant dense<0.000000e+00> : vector<8x48xf32>
    %9 = tpu.matmul %7, %8, %cst_1 {dimension_numbers = #tpu.dot_dimension_numbers<[1], [0], [0], [1], [0, 0, 1, 1], [], []>} : vector<8x8xf32>, vector<8x48xf32>, vector<8x48xf32> -> vector<8x48xf32>
    %c0_2 = arith.constant 0 : index
    %c0_3 = arith.constant 0 : index
    %10 = vector.load %arg2[%c0_2, %c0_3] : memref<1x48xf32, #tpu.memory_space<vmem>>, vector<1x48xf32>
    %11 = vector.broadcast %10 : vector<1x48xf32> to vector<8x48xf32>
    %12 = arith.addf %9, %11 : vector<8x48xf32>
    %c0_4 = arith.constant 0 : index
    %c0_5 = arith.constant 0 : index
    %13 = vector.load %arg3[%c0_4, %c0_5] : memref<16x48xf32, #tpu.memory_space<vmem>>, vector<16x48xf32>
    %cst_6 = arith.constant dense<0.000000e+00> : vector<8x48xf32>
    %14 = tpu.matmul %3, %13, %cst_6 {dimension_numbers = #tpu.dot_dimension_numbers<[1], [0], [0], [1], [0, 0, 1, 1], [], []>} : vector<8x16xf32>, vector<16x48xf32>, vector<8x48xf32> -> vector<8x48xf32>
    %c0_7 = arith.constant 0 : index
    %c0_8 = arith.constant 0 : index
    %15 = vector.load %arg4[%c0_7, %c0_8] : memref<1x48xf32, #tpu.memory_space<vmem>>, vector<1x48xf32>
    %16 = vector.broadcast %15 : vector<1x48xf32> to vector<8x48xf32>
    %17 = arith.addf %14, %16 : vector<8x48xf32>
    %18 = vector.extract_strided_slice %12 {offsets = [0, 0], sizes = [8, 16], strides = [1, 1]} : vector<8x48xf32> to vector<8x16xf32>
    %19 = vector.extract_strided_slice %17 {offsets = [0, 0], sizes = [8, 16], strides = [1, 1]} : vector<8x48xf32> to vector<8x16xf32>
    %20 = arith.addf %18, %19 : vector<8x16xf32>
    %21 = arith.negf %20 : vector<8x16xf32>
    %22 = math.exp %21 : vector<8x16xf32>
    %cst_9 = arith.constant 1.000000e+00 : f32
    %23 = vector.broadcast %cst_9 : f32 to vector<8x16xf32>
    %24 = arith.addf %23, %22 : vector<8x16xf32>
    %25 = arith.divf %23, %24 : vector<8x16xf32>
    %26 = vector.extract_strided_slice %12 {offsets = [0, 16], sizes = [8, 16], strides = [1, 1]} : vector<8x48xf32> to vector<8x16xf32>
    %27 = vector.extract_strided_slice %17 {offsets = [0, 16], sizes = [8, 16], strides = [1, 1]} : vector<8x48xf32> to vector<8x16xf32>
    %28 = arith.addf %26, %27 : vector<8x16xf32>
    %29 = arith.negf %28 : vector<8x16xf32>
    %30 = math.exp %29 : vector<8x16xf32>
    %cst_10 = arith.constant 1.000000e+00 : f32
    %31 = vector.broadcast %cst_10 : f32 to vector<8x16xf32>
    %32 = arith.addf %31, %30 : vector<8x16xf32>
    %33 = arith.divf %31, %32 : vector<8x16xf32>
    %34 = vector.extract_strided_slice %12 {offsets = [0, 32], sizes = [8, 16], strides = [1, 1]} : vector<8x48xf32> to vector<8x16xf32>
    %35 = vector.extract_strided_slice %17 {offsets = [0, 32], sizes = [8, 16], strides = [1, 1]} : vector<8x48xf32> to vector<8x16xf32>
    %36 = arith.mulf %25, %35 : vector<8x16xf32>
    %37 = arith.addf %34, %36 : vector<8x16xf32>
    %38 = math.tanh %37 : vector<8x16xf32>
    %cst_11 = arith.constant 1.000000e+00 : f32
    %39 = vector.broadcast %cst_11 : f32 to vector<8x16xf32>
    %40 = arith.subf %39, %33 : vector<8x16xf32>
    %41 = arith.mulf %40, %38 : vector<8x16xf32>
    %42 = arith.mulf %33, %3 : vector<8x16xf32>
    %43 = arith.addf %41, %42 : vector<8x16xf32>
    %cst_12 = arith.constant 0.000000e+00 : f32
    %44 = vector.broadcast %cst_12 : f32 to vector<8x1xf32>
    %c0_i32_13 = arith.constant 0 : i32
    %45 = vector.broadcast %c0_i32_13 : i32 to vector<8x8xi32>
    %c0_i32_14 = arith.constant 0 : i32
    %46 = arith.index_cast %c0_i32_14 : i32 to index
    %c0_15 = arith.constant 0 : index
    %c0_16 = arith.constant 0 : index
    %47 = vector.load %arg0[%46, %c0_15, %c0_16] : memref<8x8x16xf32, #tpu.memory_space<vmem>>, vector<1x8x16xf32>
    %48 = vector.shape_cast %47 : vector<1x8x16xf32> to vector<8x16xf32>
    %49 = arith.addf %48, %43 : vector<8x16xf32>
    %c0_17 = arith.constant 0 : index
    %c0_18 = arith.constant 0 : index
    %50 = vector.load %arg5[%c0_17, %c0_18] : memref<16x16xf32, #tpu.memory_space<vmem>>, vector<16x16xf32>
    %cst_19 = arith.constant dense<0.000000e+00> : vector<8x16xf32>
    %51 = tpu.matmul %49, %50, %cst_19 {dimension_numbers = #tpu.dot_dimension_numbers<[1], [0], [0], [1], [0, 0, 1, 1], [], []>} : vector<8x16xf32>, vector<16x16xf32>, vector<8x16xf32> -> vector<8x16xf32>
    %c0_20 = arith.constant 0 : index
    %c0_21 = arith.constant 0 : index
    %52 = vector.load %arg6[%c0_20, %c0_21] : memref<1x16xf32, #tpu.memory_space<vmem>>, vector<1x16xf32>
    %53 = vector.broadcast %52 : vector<1x16xf32> to vector<8x16xf32>
    %54 = arith.addf %51, %53 : vector<8x16xf32>
    %cst_22 = arith.constant 0.000000e+00 : f32
    %55 = vector.broadcast %cst_22 : f32 to vector<8x16xf32>
    %56 = arith.cmpf oge, %54, %55 : vector<8x16xf32>
    %cst_23 = arith.constant 0.00999999977 : f32
    %57 = vector.broadcast %cst_23 : f32 to vector<8x16xf32>
    %58 = arith.mulf %57, %54 : vector<8x16xf32>
    %59 = arith.select %56, %54, %58 : vector<8x16xi1>, vector<8x16xf32>
    %c0_24 = arith.constant 0 : index
    %c0_25 = arith.constant 0 : index
    %60 = vector.load %arg7[%c0_24, %c0_25] : memref<16x8xf32, #tpu.memory_space<vmem>>, vector<16x8xf32>
    %cst_26 = arith.constant dense<0.000000e+00> : vector<8x8xf32>
    %61 = tpu.matmul %59, %60, %cst_26 {dimension_numbers = #tpu.dot_dimension_numbers<[1], [0], [0], [1], [0, 0, 1, 1], [], []>} : vector<8x16xf32>, vector<16x8xf32>, vector<8x8xf32> -> vector<8x8xf32>
    %c0_27 = arith.constant 0 : index
    %c0_28 = arith.constant 0 : index
    %62 = vector.load %arg8[%c0_27, %c0_28] : memref<1x8xf32, #tpu.memory_space<vmem>>, vector<1x8xf32>
    %63 = vector.broadcast %62 : vector<1x8xf32> to vector<8x8xf32>
    %64 = arith.addf %61, %63 : vector<8x8xf32>
    %cst_29 = arith.constant dense<0xFF800000> : vector<8xf32>
    %65 = vector.multi_reduction <maximumf>, %64, %cst_29 [1] : vector<8x8xf32> to vector<8xf32>
    %66 = vector.shape_cast %65 : vector<8xf32> to vector<8x1xf32>
    %67 = vector.broadcast %66 : vector<8x1xf32> to vector<8x8xf32>
    %68 = arith.subf %64, %67 : vector<8x8xf32>
    %69 = math.exp %68 : vector<8x8xf32>
    %cst_30 = arith.constant dense<0.000000e+00> : vector<8xf32>
    %70 = vector.multi_reduction <add>, %69, %cst_30 [1] : vector<8x8xf32> to vector<8xf32>
    %71 = vector.shape_cast %70 : vector<8xf32> to vector<8x1xf32>
    %72 = math.log %71 : vector<8x1xf32>
    %cst_31 = arith.constant 0.000000e+00 : f32
    %73 = vector.broadcast %cst_31 : f32 to vector<8x1xf32>
    %74 = arith.subf %73, %72 : vector<8x1xf32>
    %75 = vector.broadcast %66 : vector<8x1xf32> to vector<8x8xf32>
    %76 = arith.cmpf oeq, %64, %75 : vector<8x8xf32>
    %c8_i32 = arith.constant 8 : i32
    %77 = vector.broadcast %c8_i32 : i32 to vector<8x8xi32>
    %78 = arith.select %76, %0, %77 : vector<8x8xi1>, vector<8x8xi32>
    %cst_32 = arith.constant dense<2147483647> : vector<8xi32>
    %79 = vector.multi_reduction <minsi>, %78, %cst_32 [1] : vector<8x8xi32> to vector<8xi32>
    %80 = vector.shape_cast %79 : vector<8xi32> to vector<8x1xi32>
    %c0_i32_33 = arith.constant 0 : i32
    %81 = vector.broadcast %c0_i32_33 : i32 to vector<8x1xi32>
    %82 = arith.cmpi ne, %80, %81 : vector<8x1xi32>
    %c0_i32_34 = arith.constant 0 : i32
    %83 = vector.broadcast %c0_i32_34 : i32 to vector<8x1xi32>
    %84 = arith.select %82, %80, %83 : vector<8x1xi1>, vector<8x1xi32>
    %85 = vector.broadcast %c0_i32_14 : i32 to vector<8x8xi32>
    %86 = arith.cmpi eq, %1, %85 : vector<8x8xi32>
    %87 = vector.shape_cast %84 : vector<8x1xi32> to vector<8x1xi32>
    %88 = vector.broadcast %87 : vector<8x1xi32> to vector<8x8xi32>
    %89 = arith.select %86, %88, %45 : vector<8x8xi1>, vector<8x8xi32>
    %cst_35 = arith.constant 0.000000e+00 : f32
    %90 = vector.broadcast %cst_35 : f32 to vector<8x1xf32>
    %91 = arith.select %82, %74, %90 : vector<8x1xi1>, vector<8x1xf32>
    %92 = arith.addf %44, %91 : vector<8x1xf32>
    %93 = arith.select %82, %80, %2 : vector<8x1xi1>, vector<8x1xi32>
    %94 = vector.broadcast %93 : vector<8x1xi32> to vector<8x8xi32>
    %95 = arith.cmpi eq, %0, %94 : vector<8x8xi32>
    %96 = arith.extui %95 : vector<8x8xi1> to vector<8x8xi32>
    %97 = arith.sitofp %96 : vector<8x8xi32> to vector<8x8xf32>
    %c0_36 = arith.constant 0 : index
    %c0_37 = arith.constant 0 : index
    %98 = vector.load %arg1[%c0_36, %c0_37] : memref<8x48xf32, #tpu.memory_space<vmem>>, vector<8x48xf32>
    %cst_38 = arith.constant dense<0.000000e+00> : vector<8x48xf32>
    %99 = tpu.matmul %97, %98, %cst_38 {dimension_numbers = #tpu.dot_dimension_numbers<[1], [0], [0], [1], [0, 0, 1, 1], [], []>} : vector<8x8xf32>, vector<8x48xf32>, vector<8x48xf32> -> vector<8x48xf32>
    %c0_39 = arith.constant 0 : index
    %c0_40 = arith.constant 0 : index
    %100 = vector.load %arg2[%c0_39, %c0_40] : memref<1x48xf32, #tpu.memory_space<vmem>>, vector<1x48xf32>
    %101 = vector.broadcast %100 : vector<1x48xf32> to vector<8x48xf32>
    %102 = arith.addf %99, %101 : vector<8x48xf32>
    %c0_41 = arith.constant 0 : index
    %c0_42 = arith.constant 0 : index
    %103 = vector.load %arg3[%c0_41, %c0_42] : memref<16x48xf32, #tpu.memory_space<vmem>>, vector<16x48xf32>
    %cst_43 = arith.constant dense<0.000000e+00> : vector<8x48xf32>
    %104 = tpu.matmul %43, %103, %cst_43 {dimension_numbers = #tpu.dot_dimension_numbers<[1], [0], [0], [1], [0, 0, 1, 1], [], []>} : vector<8x16xf32>, vector<16x48xf32>, vector<8x48xf32> -> vector<8x48xf32>
    %c0_44 = arith.constant 0 : index
    %c0_45 = arith.constant 0 : index
    %105 = vector.load %arg4[%c0_44, %c0_45] : memref<1x48xf32, #tpu.memory_space<vmem>>, vector<1x48xf32>
    %106 = vector.broadcast %105 : vector<1x48xf32> to vector<8x48xf32>
    %107 = arith.addf %104, %106 : vector<8x48xf32>
    %108 = vector.extract_strided_slice %102 {offsets = [0, 0], sizes = [8, 16], strides = [1, 1]} : vector<8x48xf32> to vector<8x16xf32>
    %109 = vector.extract_strided_slice %107 {offsets = [0, 0], sizes = [8, 16], strides = [1, 1]} : vector<8x48xf32> to vector<8x16xf32>
    %110 = arith.addf %108, %109 : vector<8x16xf32>
    %111 = arith.negf %110 : vector<8x16xf32>
    %112 = math.exp %111 : vector<8x16xf32>
    %cst_46 = arith.constant 1.000000e+00 : f32
    %113 = vector.broadcast %cst_46 : f32 to vector<8x16xf32>
    %114 = arith.addf %113, %112 : vector<8x16xf32>
    %115 = arith.divf %113, %114 : vector<8x16xf32>
    %116 = vector.extract_strided_slice %102 {offsets = [0, 16], sizes = [8, 16], strides = [1, 1]} : vector<8x48xf32> to vector<8x16xf32>
    %117 = vector.extract_strided_slice %107 {offsets = [0, 16], sizes = [8, 16], strides = [1, 1]} : vector<8x48xf32> to vector<8x16xf32>
    %118 = arith.addf %116, %117 : vector<8x16xf32>
    %119 = arith.negf %118 : vector<8x16xf32>
    %120 = math.exp %119 : vector<8x16xf32>
    %cst_47 = arith.constant 1.000000e+00 : f32
    %121 = vector.broadcast %cst_47 : f32 to vector<8x16xf32>
    %122 = arith.addf %121, %120 : vector<8x16xf32>
    %123 = arith.divf %121, %122 : vector<8x16xf32>
    %124 = vector.extract_strided_slice %102 {offsets = [0, 32], sizes = [8, 16], strides = [1, 1]} : vector<8x48xf32> to vector<8x16xf32>
    %125 = vector.extract_strided_slice %107 {offsets = [0, 32], sizes = [8, 16], strides = [1, 1]} : vector<8x48xf32> to vector<8x16xf32>
    %126 = arith.mulf %115, %125 : vector<8x16xf32>
    %127 = arith.addf %124, %126 : vector<8x16xf32>
    %128 = math.tanh %127 : vector<8x16xf32>
    %cst_48 = arith.constant 1.000000e+00 : f32
    %129 = vector.broadcast %cst_48 : f32 to vector<8x16xf32>
    %130 = arith.subf %129, %123 : vector<8x16xf32>
    %131 = arith.mulf %130, %128 : vector<8x16xf32>
    %132 = arith.mulf %123, %43 : vector<8x16xf32>
    %133 = arith.addf %131, %132 : vector<8x16xf32>
    %134 = vector.shape_cast %82 : vector<8x1xi1> to vector<8x1xi1>
    %135 = vector.broadcast %134 : vector<8x1xi1> to vector<8x16xi1>
    %136 = arith.select %135, %133, %43 : vector<8x16xi1>, vector<8x16xf32>
    %137 = vector.shape_cast %82 : vector<8x1xi1> to vector<8x1xi1>
    %138 = vector.broadcast %137 : vector<8x1xi1> to vector<8x16xi1>
    %139 = arith.select %138, %133, %43 : vector<8x16xi1>, vector<8x16xf32>
    %c1_i32 = arith.constant 1 : i32
    %140 = arith.index_cast %c1_i32 : i32 to index
    %c0_49 = arith.constant 0 : index
    %c0_50 = arith.constant 0 : index
    %141 = vector.load %arg0[%140, %c0_49, %c0_50] : memref<8x8x16xf32, #tpu.memory_space<vmem>>, vector<1x8x16xf32>
    %142 = vector.shape_cast %141 : vector<1x8x16xf32> to vector<8x16xf32>
    %143 = arith.addf %142, %139 : vector<8x16xf32>
    %c0_51 = arith.constant 0 : index
    %c0_52 = arith.constant 0 : index
    %144 = vector.load %arg5[%c0_51, %c0_52] : memref<16x16xf32, #tpu.memory_space<vmem>>, vector<16x16xf32>
    %cst_53 = arith.constant dense<0.000000e+00> : vector<8x16xf32>
    %145 = tpu.matmul %143, %144, %cst_53 {dimension_numbers = #tpu.dot_dimension_numbers<[1], [0], [0], [1], [0, 0, 1, 1], [], []>} : vector<8x16xf32>, vector<16x16xf32>, vector<8x16xf32> -> vector<8x16xf32>
    %c0_54 = arith.constant 0 : index
    %c0_55 = arith.constant 0 : index
    %146 = vector.load %arg6[%c0_54, %c0_55] : memref<1x16xf32, #tpu.memory_space<vmem>>, vector<1x16xf32>
    %147 = vector.broadcast %146 : vector<1x16xf32> to vector<8x16xf32>
    %148 = arith.addf %145, %147 : vector<8x16xf32>
    %cst_56 = arith.constant 0.000000e+00 : f32
    %149 = vector.broadcast %cst_56 : f32 to vector<8x16xf32>
    %150 = arith.cmpf oge, %148, %149 : vector<8x16xf32>
    %cst_57 = arith.constant 0.00999999977 : f32
    %151 = vector.broadcast %cst_57 : f32 to vector<8x16xf32>
    %152 = arith.mulf %151, %148 : vector<8x16xf32>
    %153 = arith.select %150, %148, %152 : vector<8x16xi1>, vector<8x16xf32>
    %c0_58 = arith.constant 0 : index
    %c0_59 = arith.constant 0 : index
    %154 = vector.load %arg7[%c0_58, %c0_59] : memref<16x8xf32, #tpu.memory_space<vmem>>, vector<16x8xf32>
    %cst_60 = arith.constant dense<0.000000e+00> : vector<8x8xf32>
    %155 = tpu.matmul %153, %154, %cst_60 {dimension_numbers = #tpu.dot_dimension_numbers<[1], [0], [0], [1], [0, 0, 1, 1], [], []>} : vector<8x16xf32>, vector<16x8xf32>, vector<8x8xf32> -> vector<8x8xf32>
    %c0_61 = arith.constant 0 : index
    %c0_62 = arith.constant 0 : index
    %156 = vector.load %arg8[%c0_61, %c0_62] : memref<1x8xf32, #tpu.memory_space<vmem>>, vector<1x8xf32>
    %157 = vector.broadcast %156 : vector<1x8xf32> to vector<8x8xf32>
    %158 = arith.addf %155, %157 : vector<8x8xf32>
    %cst_63 = arith.constant dense<0xFF800000> : vector<8xf32>
    %159 = vector.multi_reduction <maximumf>, %158, %cst_63 [1] : vector<8x8xf32> to vector<8xf32>
    %160 = vector.shape_cast %159 : vector<8xf32> to vector<8x1xf32>
    %161 = vector.broadcast %160 : vector<8x1xf32> to vector<8x8xf32>
    %162 = arith.subf %158, %161 : vector<8x8xf32>
    %163 = math.exp %162 : vector<8x8xf32>
    %cst_64 = arith.constant dense<0.000000e+00> : vector<8xf32>
    %164 = vector.multi_reduction <add>, %163, %cst_64 [1] : vector<8x8xf32> to vector<8xf32>
    %165 = vector.shape_cast %164 : vector<8xf32> to vector<8x1xf32>
    %166 = math.log %165 : vector<8x1xf32>
    %cst_65 = arith.constant 0.000000e+00 : f32
    %167 = vector.broadcast %cst_65 : f32 to vector<8x1xf32>
    %168 = arith.subf %167, %166 : vector<8x1xf32>
    %169 = vector.broadcast %160 : vector<8x1xf32> to vector<8x8xf32>
    %170 = arith.cmpf oeq, %158, %169 : vector<8x8xf32>
    %c8_i32_66 = arith.constant 8 : i32
    %171 = vector.broadcast %c8_i32_66 : i32 to vector<8x8xi32>
    %172 = arith.select %170, %0, %171 : vector<8x8xi1>, vector<8x8xi32>
    %cst_67 = arith.constant dense<2147483647> : vector<8xi32>
    %173 = vector.multi_reduction <minsi>, %172, %cst_67 [1] : vector<8x8xi32> to vector<8xi32>
    %174 = vector.shape_cast %173 : vector<8xi32> to vector<8x1xi32>
    %c0_i32_68 = arith.constant 0 : i32
    %175 = vector.broadcast %c0_i32_68 : i32 to vector<8x1xi32>
    %176 = arith.cmpi ne, %174, %175 : vector<8x1xi32>
    %c0_i32_69 = arith.constant 0 : i32
    %177 = vector.broadcast %c0_i32_69 : i32 to vector<8x1xi32>
    %178 = arith.select %176, %174, %177 : vector<8x1xi1>, vector<8x1xi32>
    %179 = vector.broadcast %c1_i32 : i32 to vector<8x8xi32>
    %180 = arith.cmpi eq, %1, %179 : vector<8x8xi32>
    %181 = vector.shape_cast %178 : vector<8x1xi32> to vector<8x1xi32>
    %182 = vector.broadcast %181 : vector<8x1xi32> to vector<8x8xi32>
    %183 = arith.select %180, %182, %89 : vector<8x8xi1>, vector<8x8xi32>
    %cst_70 = arith.constant 0.000000e+00 : f32
    %184 = vector.broadcast %cst_70 : f32 to vector<8x1xf32>
    %185 = arith.select %176, %168, %184 : vector<8x1xi1>, vector<8x1xf32>
    %186 = arith.addf %92, %185 : vector<8x1xf32>
    %187 = arith.select %176, %174, %93 : vector<8x1xi1>, vector<8x1xi32>
    %188 = vector.broadcast %187 : vector<8x1xi32> to vector<8x8xi32>
    %189 = arith.cmpi eq, %0, %188 : vector<8x8xi32>
    %190 = arith.extui %189 : vector<8x8xi1> to vector<8x8xi32>
    %191 = arith.sitofp %190 : vector<8x8xi32> to vector<8x8xf32>
    %c0_71 = arith.constant 0 : index
    %c0_72 = arith.constant 0 : index
    %192 = vector.load %arg1[%c0_71, %c0_72] : memref<8x48xf32, #tpu.memory_space<vmem>>, vector<8x48xf32>
    %cst_73 = arith.constant dense<0.000000e+00> : vector<8x48xf32>
    %193 = tpu.matmul %191, %192, %cst_73 {dimension_numbers = #tpu.dot_dimension_numbers<[1], [0], [0], [1], [0, 0, 1, 1], [], []>} : vector<8x8xf32>, vector<8x48xf32>, vector<8x48xf32> -> vector<8x48xf32>
    %c0_74 = arith.constant 0 : index
    %c0_75 = arith.constant 0 : index
    %194 = vector.load %arg2[%c0_74, %c0_75] : memref<1x48xf32, #tpu.memory_space<vmem>>, vector<1x48xf32>
    %195 = vector.broadcast %194 : vector<1x48xf32> to vector<8x48xf32>
    %196 = arith.addf %193, %195 : vector<8x48xf32>
    %c0_76 = arith.constant 0 : index
    %c0_77 = arith.constant 0 : index
    %197 = vector.load %arg3[%c0_76, %c0_77] : memref<16x48xf32, #tpu.memory_space<vmem>>, vector<16x48xf32>
    %cst_78 = arith.constant dense<0.000000e+00> : vector<8x48xf32>
    %198 = tpu.matmul %136, %197, %cst_78 {dimension_numbers = #tpu.dot_dimension_numbers<[1], [0], [0], [1], [0, 0, 1, 1], [], []>} : vector<8x16xf32>, vector<16x48xf32>, vector<8x48xf32> -> vector<8x48xf32>
    %c0_79 = arith.constant 0 : index
    %c0_80 = arith.constant 0 : index
    %199 = vector.load %arg4[%c0_79, %c0_80] : memref<1x48xf32, #tpu.memory_space<vmem>>, vector<1x48xf32>
    %200 = vector.broadcast %199 : vector<1x48xf32> to vector<8x48xf32>
    %201 = arith.addf %198, %200 : vector<8x48xf32>
    %202 = vector.extract_strided_slice %196 {offsets = [0, 0], sizes = [8, 16], strides = [1, 1]} : vector<8x48xf32> to vector<8x16xf32>
    %203 = vector.extract_strided_slice %201 {offsets = [0, 0], sizes = [8, 16], strides = [1, 1]} : vector<8x48xf32> to vector<8x16xf32>
    %204 = arith.addf %202, %203 : vector<8x16xf32>
    %205 = arith.negf %204 : vector<8x16xf32>
    %206 = math.exp %205 : vector<8x16xf32>
    %cst_81 = arith.constant 1.000000e+00 : f32
    %207 = vector.broadcast %cst_81 : f32 to vector<8x16xf32>
    %208 = arith.addf %207, %206 : vector<8x16xf32>
    %209 = arith.divf %207, %208 : vector<8x16xf32>
    %210 = vector.extract_strided_slice %196 {offsets = [0, 16], sizes = [8, 16], strides = [1, 1]} : vector<8x48xf32> to vector<8x16xf32>
    %211 = vector.extract_strided_slice %201 {offsets = [0, 16], sizes = [8, 16], strides = [1, 1]} : vector<8x48xf32> to vector<8x16xf32>
    %212 = arith.addf %210, %211 : vector<8x16xf32>
    %213 = arith.negf %212 : vector<8x16xf32>
    %214 = math.exp %213 : vector<8x16xf32>
    %cst_82 = arith.constant 1.000000e+00 : f32
    %215 = vector.broadcast %cst_82 : f32 to vector<8x16xf32>
    %216 = arith.addf %215, %214 : vector<8x16xf32>
    %217 = arith.divf %215, %216 : vector<8x16xf32>
    %218 = vector.extract_strided_slice %196 {offsets = [0, 32], sizes = [8, 16], strides = [1, 1]} : vector<8x48xf32> to vector<8x16xf32>
    %219 = vector.extract_strided_slice %201 {offsets = [0, 32], sizes = [8, 16], strides = [1, 1]} : vector<8x48xf32> to vector<8x16xf32>
    %220 = arith.mulf %209, %219 : vector<8x16xf32>
    %221 = arith.addf %218, %220 : vector<8x16xf32>
    %222 = math.tanh %221 : vector<8x16xf32>
    %cst_83 = arith.constant 1.000000e+00 : f32
    %223 = vector.broadcast %cst_83 : f32 to vector<8x16xf32>
    %224 = arith.subf %223, %217 : vector<8x16xf32>
    %225 = arith.mulf %224, %222 : vector<8x16xf32>
    %226 = arith.mulf %217, %136 : vector<8x16xf32>
    %227 = arith.addf %225, %226 : vector<8x16xf32>
    %228 = vector.shape_cast %176 : vector<8x1xi1> to vector<8x1xi1>
    %229 = vector.broadcast %228 : vector<8x1xi1> to vector<8x16xi1>
    %230 = arith.select %229, %227, %136 : vector<8x16xi1>, vector<8x16xf32>
    %231 = vector.shape_cast %176 : vector<8x1xi1> to vector<8x1xi1>
    %232 = vector.broadcast %231 : vector<8x1xi1> to vector<8x16xi1>
    %233 = arith.select %232, %227, %139 : vector<8x16xi1>, vector<8x16xf32>
    %c2_i32 = arith.constant 2 : i32
    %234 = arith.index_cast %c2_i32 : i32 to index
    %c0_84 = arith.constant 0 : index
    %c0_85 = arith.constant 0 : index
    %235 = vector.load %arg0[%234, %c0_84, %c0_85] : memref<8x8x16xf32, #tpu.memory_space<vmem>>, vector<1x8x16xf32>
    %236 = vector.shape_cast %235 : vector<1x8x16xf32> to vector<8x16xf32>
    %237 = arith.addf %236, %233 : vector<8x16xf32>
    %c0_86 = arith.constant 0 : index
    %c0_87 = arith.constant 0 : index
    %238 = vector.load %arg5[%c0_86, %c0_87] : memref<16x16xf32, #tpu.memory_space<vmem>>, vector<16x16xf32>
    %cst_88 = arith.constant dense<0.000000e+00> : vector<8x16xf32>
    %239 = tpu.matmul %237, %238, %cst_88 {dimension_numbers = #tpu.dot_dimension_numbers<[1], [0], [0], [1], [0, 0, 1, 1], [], []>} : vector<8x16xf32>, vector<16x16xf32>, vector<8x16xf32> -> vector<8x16xf32>
    %c0_89 = arith.constant 0 : index
    %c0_90 = arith.constant 0 : index
    %240 = vector.load %arg6[%c0_89, %c0_90] : memref<1x16xf32, #tpu.memory_space<vmem>>, vector<1x16xf32>
    %241 = vector.broadcast %240 : vector<1x16xf32> to vector<8x16xf32>
    %242 = arith.addf %239, %241 : vector<8x16xf32>
    %cst_91 = arith.constant 0.000000e+00 : f32
    %243 = vector.broadcast %cst_91 : f32 to vector<8x16xf32>
    %244 = arith.cmpf oge, %242, %243 : vector<8x16xf32>
    %cst_92 = arith.constant 0.00999999977 : f32
    %245 = vector.broadcast %cst_92 : f32 to vector<8x16xf32>
    %246 = arith.mulf %245, %242 : vector<8x16xf32>
    %247 = arith.select %244, %242, %246 : vector<8x16xi1>, vector<8x16xf32>
    %c0_93 = arith.constant 0 : index
    %c0_94 = arith.constant 0 : index
    %248 = vector.load %arg7[%c0_93, %c0_94] : memref<16x8xf32, #tpu.memory_space<vmem>>, vector<16x8xf32>
    %cst_95 = arith.constant dense<0.000000e+00> : vector<8x8xf32>
    %249 = tpu.matmul %247, %248, %cst_95 {dimension_numbers = #tpu.dot_dimension_numbers<[1], [0], [0], [1], [0, 0, 1, 1], [], []>} : vector<8x16xf32>, vector<16x8xf32>, vector<8x8xf32> -> vector<8x8xf32>
    %c0_96 = arith.constant 0 : index
    %c0_97 = arith.constant 0 : index
    %250 = vector.load %arg8[%c0_96, %c0_97] : memref<1x8xf32, #tpu.memory_space<vmem>>, vector<1x8xf32>
    %251 = vector.broadcast %250 : vector<1x8xf32> to vector<8x8xf32>
    %252 = arith.addf %249, %251 : vector<8x8xf32>
    %cst_98 = arith.constant dense<0xFF800000> : vector<8xf32>
    %253 = vector.multi_reduction <maximumf>, %252, %cst_98 [1] : vector<8x8xf32> to vector<8xf32>
    %254 = vector.shape_cast %253 : vector<8xf32> to vector<8x1xf32>
    %255 = vector.broadcast %254 : vector<8x1xf32> to vector<8x8xf32>
    %256 = arith.subf %252, %255 : vector<8x8xf32>
    %257 = math.exp %256 : vector<8x8xf32>
    %cst_99 = arith.constant dense<0.000000e+00> : vector<8xf32>
    %258 = vector.multi_reduction <add>, %257, %cst_99 [1] : vector<8x8xf32> to vector<8xf32>
    %259 = vector.shape_cast %258 : vector<8xf32> to vector<8x1xf32>
    %260 = math.log %259 : vector<8x1xf32>
    %cst_100 = arith.constant 0.000000e+00 : f32
    %261 = vector.broadcast %cst_100 : f32 to vector<8x1xf32>
    %262 = arith.subf %261, %260 : vector<8x1xf32>
    %263 = vector.broadcast %254 : vector<8x1xf32> to vector<8x8xf32>
    %264 = arith.cmpf oeq, %252, %263 : vector<8x8xf32>
    %c8_i32_101 = arith.constant 8 : i32
    %265 = vector.broadcast %c8_i32_101 : i32 to vector<8x8xi32>
    %266 = arith.select %264, %0, %265 : vector<8x8xi1>, vector<8x8xi32>
    %cst_102 = arith.constant dense<2147483647> : vector<8xi32>
    %267 = vector.multi_reduction <minsi>, %266, %cst_102 [1] : vector<8x8xi32> to vector<8xi32>
    %268 = vector.shape_cast %267 : vector<8xi32> to vector<8x1xi32>
    %c0_i32_103 = arith.constant 0 : i32
    %269 = vector.broadcast %c0_i32_103 : i32 to vector<8x1xi32>
    %270 = arith.cmpi ne, %268, %269 : vector<8x1xi32>
    %c0_i32_104 = arith.constant 0 : i32
    %271 = vector.broadcast %c0_i32_104 : i32 to vector<8x1xi32>
    %272 = arith.select %270, %268, %271 : vector<8x1xi1>, vector<8x1xi32>
    %273 = vector.broadcast %c2_i32 : i32 to vector<8x8xi32>
    %274 = arith.cmpi eq, %1, %273 : vector<8x8xi32>
    %275 = vector.shape_cast %272 : vector<8x1xi32> to vector<8x1xi32>
    %276 = vector.broadcast %275 : vector<8x1xi32> to vector<8x8xi32>
    %277 = arith.select %274, %276, %183 : vector<8x8xi1>, vector<8x8xi32>
    %cst_105 = arith.constant 0.000000e+00 : f32
    %278 = vector.broadcast %cst_105 : f32 to vector<8x1xf32>
    %279 = arith.select %270, %262, %278 : vector<8x1xi1>, vector<8x1xf32>
    %280 = arith.addf %186, %279 : vector<8x1xf32>
    %281 = arith.select %270, %268, %187 : vector<8x1xi1>, vector<8x1xi32>
    %282 = vector.broadcast %281 : vector<8x1xi32> to vector<8x8xi32>
    %283 = arith.cmpi eq, %0, %282 : vector<8x8xi32>
    %284 = arith.extui %283 : vector<8x8xi1> to vector<8x8xi32>
    %285 = arith.sitofp %284 : vector<8x8xi32> to vector<8x8xf32>
    %c0_106 = arith.constant 0 : index
    %c0_107 = arith.constant 0 : index
    %286 = vector.load %arg1[%c0_106, %c0_107] : memref<8x48xf32, #tpu.memory_space<vmem>>, vector<8x48xf32>
    %cst_108 = arith.constant dense<0.000000e+00> : vector<8x48xf32>
    %287 = tpu.matmul %285, %286, %cst_108 {dimension_numbers = #tpu.dot_dimension_numbers<[1], [0], [0], [1], [0, 0, 1, 1], [], []>} : vector<8x8xf32>, vector<8x48xf32>, vector<8x48xf32> -> vector<8x48xf32>
    %c0_109 = arith.constant 0 : index
    %c0_110 = arith.constant 0 : index
    %288 = vector.load %arg2[%c0_109, %c0_110] : memref<1x48xf32, #tpu.memory_space<vmem>>, vector<1x48xf32>
    %289 = vector.broadcast %288 : vector<1x48xf32> to vector<8x48xf32>
    %290 = arith.addf %287, %289 : vector<8x48xf32>
    %c0_111 = arith.constant 0 : index
    %c0_112 = arith.constant 0 : index
    %291 = vector.load %arg3[%c0_111, %c0_112] : memref<16x48xf32, #tpu.memory_space<vmem>>, vector<16x48xf32>
    %cst_113 = arith.constant dense<0.000000e+00> : vector<8x48xf32>
    %292 = tpu.matmul %230, %291, %cst_113 {dimension_numbers = #tpu.dot_dimension_numbers<[1], [0], [0], [1], [0, 0, 1, 1], [], []>} : vector<8x16xf32>, vector<16x48xf32>, vector<8x48xf32> -> vector<8x48xf32>
    %c0_114 = arith.constant 0 : index
    %c0_115 = arith.constant 0 : index
    %293 = vector.load %arg4[%c0_114, %c0_115] : memref<1x48xf32, #tpu.memory_space<vmem>>, vector<1x48xf32>
    %294 = vector.broadcast %293 : vector<1x48xf32> to vector<8x48xf32>
    %295 = arith.addf %292, %294 : vector<8x48xf32>
    %296 = vector.extract_strided_slice %290 {offsets = [0, 0], sizes = [8, 16], strides = [1, 1]} : vector<8x48xf32> to vector<8x16xf32>
    %297 = vector.extract_strided_slice %295 {offsets = [0, 0], sizes = [8, 16], strides = [1, 1]} : vector<8x48xf32> to vector<8x16xf32>
    %298 = arith.addf %296, %297 : vector<8x16xf32>
    %299 = arith.negf %298 : vector<8x16xf32>
    %300 = math.exp %299 : vector<8x16xf32>
    %cst_116 = arith.constant 1.000000e+00 : f32
    %301 = vector.broadcast %cst_116 : f32 to vector<8x16xf32>
    %302 = arith.addf %301, %300 : vector<8x16xf32>
    %303 = arith.divf %301, %302 : vector<8x16xf32>
    %304 = vector.extract_strided_slice %290 {offsets = [0, 16], sizes = [8, 16], strides = [1, 1]} : vector<8x48xf32> to vector<8x16xf32>
    %305 = vector.extract_strided_slice %295 {offsets = [0, 16], sizes = [8, 16], strides = [1, 1]} : vector<8x48xf32> to vector<8x16xf32>
    %306 = arith.addf %304, %305 : vector<8x16xf32>
    %307 = arith.negf %306 : vector<8x16xf32>
    %308 = math.exp %307 : vector<8x16xf32>
    %cst_117 = arith.constant 1.000000e+00 : f32
    %309 = vector.broadcast %cst_117 : f32 to vector<8x16xf32>
    %310 = arith.addf %309, %308 : vector<8x16xf32>
    %311 = arith.divf %309, %310 : vector<8x16xf32>
    %312 = vector.extract_strided_slice %290 {offsets = [0, 32], sizes = [8, 16], strides = [1, 1]} : vector<8x48xf32> to vector<8x16xf32>
    %313 = vector.extract_strided_slice %295 {offsets = [0, 32], sizes = [8, 16], strides = [1, 1]} : vector<8x48xf32> to vector<8x16xf32>
    %314 = arith.mulf %303, %313 : vector<8x16xf32>
    %315 = arith.addf %312, %314 : vector<8x16xf32>
    %316 = math.tanh %315 : vector<8x16xf32>
    %cst_118 = arith.constant 1.000000e+00 : f32
    %317 = vector.broadcast %cst_118 : f32 to vector<8x16xf32>
    %318 = arith.subf %317, %311 : vector<8x16xf32>
    %319 = arith.mulf %318, %316 : vector<8x16xf32>
    %320 = arith.mulf %311, %230 : vector<8x16xf32>
    %321 = arith.addf %319, %320 : vector<8x16xf32>
    %322 = vector.shape_cast %270 : vector<8x1xi1> to vector<8x1xi1>
    %323 = vector.broadcast %322 : vector<8x1xi1> to vector<8x16xi1>
    %324 = arith.select %323, %321, %230 : vector<8x16xi1>, vector<8x16xf32>
    %325 = vector.shape_cast %270 : vector<8x1xi1> to vector<8x1xi1>
    %326 = vector.broadcast %325 : vector<8x1xi1> to vector<8x16xi1>
    %327 = arith.select %326, %321, %233 : vector<8x16xi1>, vector<8x16xf32>
    %c3_i32 = arith.constant 3 : i32
    %328 = arith.index_cast %c3_i32 : i32 to index
    %c0_119 = arith.constant 0 : index
    %c0_120 = arith.constant 0 : index
    %329 = vector.load %arg0[%328, %c0_119, %c0_120] : memref<8x8x16xf32, #tpu.memory_space<vmem>>, vector<1x8x16xf32>
    %330 = vector.shape_cast %329 : vector<1x8x16xf32> to vector<8x16xf32>
    %331 = arith.addf %330, %327 : vector<8x16xf32>
    %c0_121 = arith.constant 0 : index
    %c0_122 = arith.constant 0 : index
    %332 = vector.load %arg5[%c0_121, %c0_122] : memref<16x16xf32, #tpu.memory_space<vmem>>, vector<16x16xf32>
    %cst_123 = arith.constant dense<0.000000e+00> : vector<8x16xf32>
    %333 = tpu.matmul %331, %332, %cst_123 {dimension_numbers = #tpu.dot_dimension_numbers<[1], [0], [0], [1], [0, 0, 1, 1], [], []>} : vector<8x16xf32>, vector<16x16xf32>, vector<8x16xf32> -> vector<8x16xf32>
    %c0_124 = arith.constant 0 : index
    %c0_125 = arith.constant 0 : index
    %334 = vector.load %arg6[%c0_124, %c0_125] : memref<1x16xf32, #tpu.memory_space<vmem>>, vector<1x16xf32>
    %335 = vector.broadcast %334 : vector<1x16xf32> to vector<8x16xf32>
    %336 = arith.addf %333, %335 : vector<8x16xf32>
    %cst_126 = arith.constant 0.000000e+00 : f32
    %337 = vector.broadcast %cst_126 : f32 to vector<8x16xf32>
    %338 = arith.cmpf oge, %336, %337 : vector<8x16xf32>
    %cst_127 = arith.constant 0.00999999977 : f32
    %339 = vector.broadcast %cst_127 : f32 to vector<8x16xf32>
    %340 = arith.mulf %339, %336 : vector<8x16xf32>
    %341 = arith.select %338, %336, %340 : vector<8x16xi1>, vector<8x16xf32>
    %c0_128 = arith.constant 0 : index
    %c0_129 = arith.constant 0 : index
    %342 = vector.load %arg7[%c0_128, %c0_129] : memref<16x8xf32, #tpu.memory_space<vmem>>, vector<16x8xf32>
    %cst_130 = arith.constant dense<0.000000e+00> : vector<8x8xf32>
    %343 = tpu.matmul %341, %342, %cst_130 {dimension_numbers = #tpu.dot_dimension_numbers<[1], [0], [0], [1], [0, 0, 1, 1], [], []>} : vector<8x16xf32>, vector<16x8xf32>, vector<8x8xf32> -> vector<8x8xf32>
    %c0_131 = arith.constant 0 : index
    %c0_132 = arith.constant 0 : index
    %344 = vector.load %arg8[%c0_131, %c0_132] : memref<1x8xf32, #tpu.memory_space<vmem>>, vector<1x8xf32>
    %345 = vector.broadcast %344 : vector<1x8xf32> to vector<8x8xf32>
    %346 = arith.addf %343, %345 : vector<8x8xf32>
    %cst_133 = arith.constant dense<0xFF800000> : vector<8xf32>
    %347 = vector.multi_reduction <maximumf>, %346, %cst_133 [1] : vector<8x8xf32> to vector<8xf32>
    %348 = vector.shape_cast %347 : vector<8xf32> to vector<8x1xf32>
    %349 = vector.broadcast %348 : vector<8x1xf32> to vector<8x8xf32>
    %350 = arith.subf %346, %349 : vector<8x8xf32>
    %351 = math.exp %350 : vector<8x8xf32>
    %cst_134 = arith.constant dense<0.000000e+00> : vector<8xf32>
    %352 = vector.multi_reduction <add>, %351, %cst_134 [1] : vector<8x8xf32> to vector<8xf32>
    %353 = vector.shape_cast %352 : vector<8xf32> to vector<8x1xf32>
    %354 = math.log %353 : vector<8x1xf32>
    %cst_135 = arith.constant 0.000000e+00 : f32
    %355 = vector.broadcast %cst_135 : f32 to vector<8x1xf32>
    %356 = arith.subf %355, %354 : vector<8x1xf32>
    %357 = vector.broadcast %348 : vector<8x1xf32> to vector<8x8xf32>
    %358 = arith.cmpf oeq, %346, %357 : vector<8x8xf32>
    %c8_i32_136 = arith.constant 8 : i32
    %359 = vector.broadcast %c8_i32_136 : i32 to vector<8x8xi32>
    %360 = arith.select %358, %0, %359 : vector<8x8xi1>, vector<8x8xi32>
    %cst_137 = arith.constant dense<2147483647> : vector<8xi32>
    %361 = vector.multi_reduction <minsi>, %360, %cst_137 [1] : vector<8x8xi32> to vector<8xi32>
    %362 = vector.shape_cast %361 : vector<8xi32> to vector<8x1xi32>
    %c0_i32_138 = arith.constant 0 : i32
    %363 = vector.broadcast %c0_i32_138 : i32 to vector<8x1xi32>
    %364 = arith.cmpi ne, %362, %363 : vector<8x1xi32>
    %c0_i32_139 = arith.constant 0 : i32
    %365 = vector.broadcast %c0_i32_139 : i32 to vector<8x1xi32>
    %366 = arith.select %364, %362, %365 : vector<8x1xi1>, vector<8x1xi32>
    %367 = vector.broadcast %c3_i32 : i32 to vector<8x8xi32>
    %368 = arith.cmpi eq, %1, %367 : vector<8x8xi32>
    %369 = vector.shape_cast %366 : vector<8x1xi32> to vector<8x1xi32>
    %370 = vector.broadcast %369 : vector<8x1xi32> to vector<8x8xi32>
    %371 = arith.select %368, %370, %277 : vector<8x8xi1>, vector<8x8xi32>
    %cst_140 = arith.constant 0.000000e+00 : f32
    %372 = vector.broadcast %cst_140 : f32 to vector<8x1xf32>
    %373 = arith.select %364, %356, %372 : vector<8x1xi1>, vector<8x1xf32>
    %374 = arith.addf %280, %373 : vector<8x1xf32>
    %375 = arith.select %364, %362, %281 : vector<8x1xi1>, vector<8x1xi32>
    %376 = vector.broadcast %375 : vector<8x1xi32> to vector<8x8xi32>
    %377 = arith.cmpi eq, %0, %376 : vector<8x8xi32>
    %378 = arith.extui %377 : vector<8x8xi1> to vector<8x8xi32>
    %379 = arith.sitofp %378 : vector<8x8xi32> to vector<8x8xf32>
    %c0_141 = arith.constant 0 : index
    %c0_142 = arith.constant 0 : index
    %380 = vector.load %arg1[%c0_141, %c0_142] : memref<8x48xf32, #tpu.memory_space<vmem>>, vector<8x48xf32>
    %cst_143 = arith.constant dense<0.000000e+00> : vector<8x48xf32>
    %381 = tpu.matmul %379, %380, %cst_143 {dimension_numbers = #tpu.dot_dimension_numbers<[1], [0], [0], [1], [0, 0, 1, 1], [], []>} : vector<8x8xf32>, vector<8x48xf32>, vector<8x48xf32> -> vector<8x48xf32>
    %c0_144 = arith.constant 0 : index
    %c0_145 = arith.constant 0 : index
    %382 = vector.load %arg2[%c0_144, %c0_145] : memref<1x48xf32, #tpu.memory_space<vmem>>, vector<1x48xf32>
    %383 = vector.broadcast %382 : vector<1x48xf32> to vector<8x48xf32>
    %384 = arith.addf %381, %383 : vector<8x48xf32>
    %c0_146 = arith.constant 0 : index
    %c0_147 = arith.constant 0 : index
    %385 = vector.load %arg3[%c0_146, %c0_147] : memref<16x48xf32, #tpu.memory_space<vmem>>, vector<16x48xf32>
    %cst_148 = arith.constant dense<0.000000e+00> : vector<8x48xf32>
    %386 = tpu.matmul %324, %385, %cst_148 {dimension_numbers = #tpu.dot_dimension_numbers<[1], [0], [0], [1], [0, 0, 1, 1], [], []>} : vector<8x16xf32>, vector<16x48xf32>, vector<8x48xf32> -> vector<8x48xf32>
    %c0_149 = arith.constant 0 : index
    %c0_150 = arith.constant 0 : index
    %387 = vector.load %arg4[%c0_149, %c0_150] : memref<1x48xf32, #tpu.memory_space<vmem>>, vector<1x48xf32>
    %388 = vector.broadcast %387 : vector<1x48xf32> to vector<8x48xf32>
    %389 = arith.addf %386, %388 : vector<8x48xf32>
    %390 = vector.extract_strided_slice %384 {offsets = [0, 0], sizes = [8, 16], strides = [1, 1]} : vector<8x48xf32> to vector<8x16xf32>
    %391 = vector.extract_strided_slice %389 {offsets = [0, 0], sizes = [8, 16], strides = [1, 1]} : vector<8x48xf32> to vector<8x16xf32>
    %392 = arith.addf %390, %391 : vector<8x16xf32>
    %393 = arith.negf %392 : vector<8x16xf32>
    %394 = math.exp %393 : vector<8x16xf32>
    %cst_151 = arith.constant 1.000000e+00 : f32
    %395 = vector.broadcast %cst_151 : f32 to vector<8x16xf32>
    %396 = arith.addf %395, %394 : vector<8x16xf32>
    %397 = arith.divf %395, %396 : vector<8x16xf32>
    %398 = vector.extract_strided_slice %384 {offsets = [0, 16], sizes = [8, 16], strides = [1, 1]} : vector<8x48xf32> to vector<8x16xf32>
    %399 = vector.extract_strided_slice %389 {offsets = [0, 16], sizes = [8, 16], strides = [1, 1]} : vector<8x48xf32> to vector<8x16xf32>
    %400 = arith.addf %398, %399 : vector<8x16xf32>
    %401 = arith.negf %400 : vector<8x16xf32>
    %402 = math.exp %401 : vector<8x16xf32>
    %cst_152 = arith.constant 1.000000e+00 : f32
    %403 = vector.broadcast %cst_152 : f32 to vector<8x16xf32>
    %404 = arith.addf %403, %402 : vector<8x16xf32>
    %405 = arith.divf %403, %404 : vector<8x16xf32>
    %406 = vector.extract_strided_slice %384 {offsets = [0, 32], sizes = [8, 16], strides = [1, 1]} : vector<8x48xf32> to vector<8x16xf32>
    %407 = vector.extract_strided_slice %389 {offsets = [0, 32], sizes = [8, 16], strides = [1, 1]} : vector<8x48xf32> to vector<8x16xf32>
    %408 = arith.mulf %397, %407 : vector<8x16xf32>
    %409 = arith.addf %406, %408 : vector<8x16xf32>
    %410 = math.tanh %409 : vector<8x16xf32>
    %cst_153 = arith.constant 1.000000e+00 : f32
    %411 = vector.broadcast %cst_153 : f32 to vector<8x16xf32>
    %412 = arith.subf %411, %405 : vector<8x16xf32>
    %413 = arith.mulf %412, %410 : vector<8x16xf32>
    %414 = arith.mulf %405, %324 : vector<8x16xf32>
    %415 = arith.addf %413, %414 : vector<8x16xf32>
    %416 = vector.shape_cast %364 : vector<8x1xi1> to vector<8x1xi1>
    %417 = vector.broadcast %416 : vector<8x1xi1> to vector<8x16xi1>
    %418 = arith.select %417, %415, %324 : vector<8x16xi1>, vector<8x16xf32>
    %419 = vector.shape_cast %364 : vector<8x1xi1> to vector<8x1xi1>
    %420 = vector.broadcast %419 : vector<8x1xi1> to vector<8x16xi1>
    %421 = arith.select %420, %415, %327 : vector<8x16xi1>, vector<8x16xf32>
    %c4_i32 = arith.constant 4 : i32
    %422 = arith.index_cast %c4_i32 : i32 to index
    %c0_154 = arith.constant 0 : index
    %c0_155 = arith.constant 0 : index
    %423 = vector.load %arg0[%422, %c0_154, %c0_155] : memref<8x8x16xf32, #tpu.memory_space<vmem>>, vector<1x8x16xf32>
    %424 = vector.shape_cast %423 : vector<1x8x16xf32> to vector<8x16xf32>
    %425 = arith.addf %424, %421 : vector<8x16xf32>
    %c0_156 = arith.constant 0 : index
    %c0_157 = arith.constant 0 : index
    %426 = vector.load %arg5[%c0_156, %c0_157] : memref<16x16xf32, #tpu.memory_space<vmem>>, vector<16x16xf32>
    %cst_158 = arith.constant dense<0.000000e+00> : vector<8x16xf32>
    %427 = tpu.matmul %425, %426, %cst_158 {dimension_numbers = #tpu.dot_dimension_numbers<[1], [0], [0], [1], [0, 0, 1, 1], [], []>} : vector<8x16xf32>, vector<16x16xf32>, vector<8x16xf32> -> vector<8x16xf32>
    %c0_159 = arith.constant 0 : index
    %c0_160 = arith.constant 0 : index
    %428 = vector.load %arg6[%c0_159, %c0_160] : memref<1x16xf32, #tpu.memory_space<vmem>>, vector<1x16xf32>
    %429 = vector.broadcast %428 : vector<1x16xf32> to vector<8x16xf32>
    %430 = arith.addf %427, %429 : vector<8x16xf32>
    %cst_161 = arith.constant 0.000000e+00 : f32
    %431 = vector.broadcast %cst_161 : f32 to vector<8x16xf32>
    %432 = arith.cmpf oge, %430, %431 : vector<8x16xf32>
    %cst_162 = arith.constant 0.00999999977 : f32
    %433 = vector.broadcast %cst_162 : f32 to vector<8x16xf32>
    %434 = arith.mulf %433, %430 : vector<8x16xf32>
    %435 = arith.select %432, %430, %434 : vector<8x16xi1>, vector<8x16xf32>
    %c0_163 = arith.constant 0 : index
    %c0_164 = arith.constant 0 : index
    %436 = vector.load %arg7[%c0_163, %c0_164] : memref<16x8xf32, #tpu.memory_space<vmem>>, vector<16x8xf32>
    %cst_165 = arith.constant dense<0.000000e+00> : vector<8x8xf32>
    %437 = tpu.matmul %435, %436, %cst_165 {dimension_numbers = #tpu.dot_dimension_numbers<[1], [0], [0], [1], [0, 0, 1, 1], [], []>} : vector<8x16xf32>, vector<16x8xf32>, vector<8x8xf32> -> vector<8x8xf32>
    %c0_166 = arith.constant 0 : index
    %c0_167 = arith.constant 0 : index
    %438 = vector.load %arg8[%c0_166, %c0_167] : memref<1x8xf32, #tpu.memory_space<vmem>>, vector<1x8xf32>
    %439 = vector.broadcast %438 : vector<1x8xf32> to vector<8x8xf32>
    %440 = arith.addf %437, %439 : vector<8x8xf32>
    %cst_168 = arith.constant dense<0xFF800000> : vector<8xf32>
    %441 = vector.multi_reduction <maximumf>, %440, %cst_168 [1] : vector<8x8xf32> to vector<8xf32>
    %442 = vector.shape_cast %441 : vector<8xf32> to vector<8x1xf32>
    %443 = vector.broadcast %442 : vector<8x1xf32> to vector<8x8xf32>
    %444 = arith.subf %440, %443 : vector<8x8xf32>
    %445 = math.exp %444 : vector<8x8xf32>
    %cst_169 = arith.constant dense<0.000000e+00> : vector<8xf32>
    %446 = vector.multi_reduction <add>, %445, %cst_169 [1] : vector<8x8xf32> to vector<8xf32>
    %447 = vector.shape_cast %446 : vector<8xf32> to vector<8x1xf32>
    %448 = math.log %447 : vector<8x1xf32>
    %cst_170 = arith.constant 0.000000e+00 : f32
    %449 = vector.broadcast %cst_170 : f32 to vector<8x1xf32>
    %450 = arith.subf %449, %448 : vector<8x1xf32>
    %451 = vector.broadcast %442 : vector<8x1xf32> to vector<8x8xf32>
    %452 = arith.cmpf oeq, %440, %451 : vector<8x8xf32>
    %c8_i32_171 = arith.constant 8 : i32
    %453 = vector.broadcast %c8_i32_171 : i32 to vector<8x8xi32>
    %454 = arith.select %452, %0, %453 : vector<8x8xi1>, vector<8x8xi32>
    %cst_172 = arith.constant dense<2147483647> : vector<8xi32>
    %455 = vector.multi_reduction <minsi>, %454, %cst_172 [1] : vector<8x8xi32> to vector<8xi32>
    %456 = vector.shape_cast %455 : vector<8xi32> to vector<8x1xi32>
    %c0_i32_173 = arith.constant 0 : i32
    %457 = vector.broadcast %c0_i32_173 : i32 to vector<8x1xi32>
    %458 = arith.cmpi ne, %456, %457 : vector<8x1xi32>
    %c0_i32_174 = arith.constant 0 : i32
    %459 = vector.broadcast %c0_i32_174 : i32 to vector<8x1xi32>
    %460 = arith.select %458, %456, %459 : vector<8x1xi1>, vector<8x1xi32>
    %461 = vector.broadcast %c4_i32 : i32 to vector<8x8xi32>
    %462 = arith.cmpi eq, %1, %461 : vector<8x8xi32>
    %463 = vector.shape_cast %460 : vector<8x1xi32> to vector<8x1xi32>
    %464 = vector.broadcast %463 : vector<8x1xi32> to vector<8x8xi32>
    %465 = arith.select %462, %464, %371 : vector<8x8xi1>, vector<8x8xi32>
    %cst_175 = arith.constant 0.000000e+00 : f32
    %466 = vector.broadcast %cst_175 : f32 to vector<8x1xf32>
    %467 = arith.select %458, %450, %466 : vector<8x1xi1>, vector<8x1xf32>
    %468 = arith.addf %374, %467 : vector<8x1xf32>
    %469 = arith.select %458, %456, %375 : vector<8x1xi1>, vector<8x1xi32>
    %470 = vector.broadcast %469 : vector<8x1xi32> to vector<8x8xi32>
    %471 = arith.cmpi eq, %0, %470 : vector<8x8xi32>
    %472 = arith.extui %471 : vector<8x8xi1> to vector<8x8xi32>
    %473 = arith.sitofp %472 : vector<8x8xi32> to vector<8x8xf32>
    %c0_176 = arith.constant 0 : index
    %c0_177 = arith.constant 0 : index
    %474 = vector.load %arg1[%c0_176, %c0_177] : memref<8x48xf32, #tpu.memory_space<vmem>>, vector<8x48xf32>
    %cst_178 = arith.constant dense<0.000000e+00> : vector<8x48xf32>
    %475 = tpu.matmul %473, %474, %cst_178 {dimension_numbers = #tpu.dot_dimension_numbers<[1], [0], [0], [1], [0, 0, 1, 1], [], []>} : vector<8x8xf32>, vector<8x48xf32>, vector<8x48xf32> -> vector<8x48xf32>
    %c0_179 = arith.constant 0 : index
    %c0_180 = arith.constant 0 : index
    %476 = vector.load %arg2[%c0_179, %c0_180] : memref<1x48xf32, #tpu.memory_space<vmem>>, vector<1x48xf32>
    %477 = vector.broadcast %476 : vector<1x48xf32> to vector<8x48xf32>
    %478 = arith.addf %475, %477 : vector<8x48xf32>
    %c0_181 = arith.constant 0 : index
    %c0_182 = arith.constant 0 : index
    %479 = vector.load %arg3[%c0_181, %c0_182] : memref<16x48xf32, #tpu.memory_space<vmem>>, vector<16x48xf32>
    %cst_183 = arith.constant dense<0.000000e+00> : vector<8x48xf32>
    %480 = tpu.matmul %418, %479, %cst_183 {dimension_numbers = #tpu.dot_dimension_numbers<[1], [0], [0], [1], [0, 0, 1, 1], [], []>} : vector<8x16xf32>, vector<16x48xf32>, vector<8x48xf32> -> vector<8x48xf32>
    %c0_184 = arith.constant 0 : index
    %c0_185 = arith.constant 0 : index
    %481 = vector.load %arg4[%c0_184, %c0_185] : memref<1x48xf32, #tpu.memory_space<vmem>>, vector<1x48xf32>
    %482 = vector.broadcast %481 : vector<1x48xf32> to vector<8x48xf32>
    %483 = arith.addf %480, %482 : vector<8x48xf32>
    %484 = vector.extract_strided_slice %478 {offsets = [0, 0], sizes = [8, 16], strides = [1, 1]} : vector<8x48xf32> to vector<8x16xf32>
    %485 = vector.extract_strided_slice %483 {offsets = [0, 0], sizes = [8, 16], strides = [1, 1]} : vector<8x48xf32> to vector<8x16xf32>
    %486 = arith.addf %484, %485 : vector<8x16xf32>
    %487 = arith.negf %486 : vector<8x16xf32>
    %488 = math.exp %487 : vector<8x16xf32>
    %cst_186 = arith.constant 1.000000e+00 : f32
    %489 = vector.broadcast %cst_186 : f32 to vector<8x16xf32>
    %490 = arith.addf %489, %488 : vector<8x16xf32>
    %491 = arith.divf %489, %490 : vector<8x16xf32>
    %492 = vector.extract_strided_slice %478 {offsets = [0, 16], sizes = [8, 16], strides = [1, 1]} : vector<8x48xf32> to vector<8x16xf32>
    %493 = vector.extract_strided_slice %483 {offsets = [0, 16], sizes = [8, 16], strides = [1, 1]} : vector<8x48xf32> to vector<8x16xf32>
    %494 = arith.addf %492, %493 : vector<8x16xf32>
    %495 = arith.negf %494 : vector<8x16xf32>
    %496 = math.exp %495 : vector<8x16xf32>
    %cst_187 = arith.constant 1.000000e+00 : f32
    %497 = vector.broadcast %cst_187 : f32 to vector<8x16xf32>
    %498 = arith.addf %497, %496 : vector<8x16xf32>
    %499 = arith.divf %497, %498 : vector<8x16xf32>
    %500 = vector.extract_strided_slice %478 {offsets = [0, 32], sizes = [8, 16], strides = [1, 1]} : vector<8x48xf32> to vector<8x16xf32>
    %501 = vector.extract_strided_slice %483 {offsets = [0, 32], sizes = [8, 16], strides = [1, 1]} : vector<8x48xf32> to vector<8x16xf32>
    %502 = arith.mulf %491, %501 : vector<8x16xf32>
    %503 = arith.addf %500, %502 : vector<8x16xf32>
    %504 = math.tanh %503 : vector<8x16xf32>
    %cst_188 = arith.constant 1.000000e+00 : f32
    %505 = vector.broadcast %cst_188 : f32 to vector<8x16xf32>
    %506 = arith.subf %505, %499 : vector<8x16xf32>
    %507 = arith.mulf %506, %504 : vector<8x16xf32>
    %508 = arith.mulf %499, %418 : vector<8x16xf32>
    %509 = arith.addf %507, %508 : vector<8x16xf32>
    %510 = vector.shape_cast %458 : vector<8x1xi1> to vector<8x1xi1>
    %511 = vector.broadcast %510 : vector<8x1xi1> to vector<8x16xi1>
    %512 = arith.select %511, %509, %418 : vector<8x16xi1>, vector<8x16xf32>
    %513 = vector.shape_cast %458 : vector<8x1xi1> to vector<8x1xi1>
    %514 = vector.broadcast %513 : vector<8x1xi1> to vector<8x16xi1>
    %515 = arith.select %514, %509, %421 : vector<8x16xi1>, vector<8x16xf32>
    %c5_i32 = arith.constant 5 : i32
    %516 = arith.index_cast %c5_i32 : i32 to index
    %c0_189 = arith.constant 0 : index
    %c0_190 = arith.constant 0 : index
    %517 = vector.load %arg0[%516, %c0_189, %c0_190] : memref<8x8x16xf32, #tpu.memory_space<vmem>>, vector<1x8x16xf32>
    %518 = vector.shape_cast %517 : vector<1x8x16xf32> to vector<8x16xf32>
    %519 = arith.addf %518, %515 : vector<8x16xf32>
    %c0_191 = arith.constant 0 : index
    %c0_192 = arith.constant 0 : index
    %520 = vector.load %arg5[%c0_191, %c0_192] : memref<16x16xf32, #tpu.memory_space<vmem>>, vector<16x16xf32>
    %cst_193 = arith.constant dense<0.000000e+00> : vector<8x16xf32>
    %521 = tpu.matmul %519, %520, %cst_193 {dimension_numbers = #tpu.dot_dimension_numbers<[1], [0], [0], [1], [0, 0, 1, 1], [], []>} : vector<8x16xf32>, vector<16x16xf32>, vector<8x16xf32> -> vector<8x16xf32>
    %c0_194 = arith.constant 0 : index
    %c0_195 = arith.constant 0 : index
    %522 = vector.load %arg6[%c0_194, %c0_195] : memref<1x16xf32, #tpu.memory_space<vmem>>, vector<1x16xf32>
    %523 = vector.broadcast %522 : vector<1x16xf32> to vector<8x16xf32>
    %524 = arith.addf %521, %523 : vector<8x16xf32>
    %cst_196 = arith.constant 0.000000e+00 : f32
    %525 = vector.broadcast %cst_196 : f32 to vector<8x16xf32>
    %526 = arith.cmpf oge, %524, %525 : vector<8x16xf32>
    %cst_197 = arith.constant 0.00999999977 : f32
    %527 = vector.broadcast %cst_197 : f32 to vector<8x16xf32>
    %528 = arith.mulf %527, %524 : vector<8x16xf32>
    %529 = arith.select %526, %524, %528 : vector<8x16xi1>, vector<8x16xf32>
    %c0_198 = arith.constant 0 : index
    %c0_199 = arith.constant 0 : index
    %530 = vector.load %arg7[%c0_198, %c0_199] : memref<16x8xf32, #tpu.memory_space<vmem>>, vector<16x8xf32>
    %cst_200 = arith.constant dense<0.000000e+00> : vector<8x8xf32>
    %531 = tpu.matmul %529, %530, %cst_200 {dimension_numbers = #tpu.dot_dimension_numbers<[1], [0], [0], [1], [0, 0, 1, 1], [], []>} : vector<8x16xf32>, vector<16x8xf32>, vector<8x8xf32> -> vector<8x8xf32>
    %c0_201 = arith.constant 0 : index
    %c0_202 = arith.constant 0 : index
    %532 = vector.load %arg8[%c0_201, %c0_202] : memref<1x8xf32, #tpu.memory_space<vmem>>, vector<1x8xf32>
    %533 = vector.broadcast %532 : vector<1x8xf32> to vector<8x8xf32>
    %534 = arith.addf %531, %533 : vector<8x8xf32>
    %cst_203 = arith.constant dense<0xFF800000> : vector<8xf32>
    %535 = vector.multi_reduction <maximumf>, %534, %cst_203 [1] : vector<8x8xf32> to vector<8xf32>
    %536 = vector.shape_cast %535 : vector<8xf32> to vector<8x1xf32>
    %537 = vector.broadcast %536 : vector<8x1xf32> to vector<8x8xf32>
    %538 = arith.subf %534, %537 : vector<8x8xf32>
    %539 = math.exp %538 : vector<8x8xf32>
    %cst_204 = arith.constant dense<0.000000e+00> : vector<8xf32>
    %540 = vector.multi_reduction <add>, %539, %cst_204 [1] : vector<8x8xf32> to vector<8xf32>
    %541 = vector.shape_cast %540 : vector<8xf32> to vector<8x1xf32>
    %542 = math.log %541 : vector<8x1xf32>
    %cst_205 = arith.constant 0.000000e+00 : f32
    %543 = vector.broadcast %cst_205 : f32 to vector<8x1xf32>
    %544 = arith.subf %543, %542 : vector<8x1xf32>
    %545 = vector.broadcast %536 : vector<8x1xf32> to vector<8x8xf32>
    %546 = arith.cmpf oeq, %534, %545 : vector<8x8xf32>
    %c8_i32_206 = arith.constant 8 : i32
    %547 = vector.broadcast %c8_i32_206 : i32 to vector<8x8xi32>
    %548 = arith.select %546, %0, %547 : vector<8x8xi1>, vector<8x8xi32>
    %cst_207 = arith.constant dense<2147483647> : vector<8xi32>
    %549 = vector.multi_reduction <minsi>, %548, %cst_207 [1] : vector<8x8xi32> to vector<8xi32>
    %550 = vector.shape_cast %549 : vector<8xi32> to vector<8x1xi32>
    %c0_i32_208 = arith.constant 0 : i32
    %551 = vector.broadcast %c0_i32_208 : i32 to vector<8x1xi32>
    %552 = arith.cmpi ne, %550, %551 : vector<8x1xi32>
    %c0_i32_209 = arith.constant 0 : i32
    %553 = vector.broadcast %c0_i32_209 : i32 to vector<8x1xi32>
    %554 = arith.select %552, %550, %553 : vector<8x1xi1>, vector<8x1xi32>
    %555 = vector.broadcast %c5_i32 : i32 to vector<8x8xi32>
    %556 = arith.cmpi eq, %1, %555 : vector<8x8xi32>
    %557 = vector.shape_cast %554 : vector<8x1xi32> to vector<8x1xi32>
    %558 = vector.broadcast %557 : vector<8x1xi32> to vector<8x8xi32>
    %559 = arith.select %556, %558, %465 : vector<8x8xi1>, vector<8x8xi32>
    %cst_210 = arith.constant 0.000000e+00 : f32
    %560 = vector.broadcast %cst_210 : f32 to vector<8x1xf32>
    %561 = arith.select %552, %544, %560 : vector<8x1xi1>, vector<8x1xf32>
    %562 = arith.addf %468, %561 : vector<8x1xf32>
    %563 = arith.select %552, %550, %469 : vector<8x1xi1>, vector<8x1xi32>
    %564 = vector.broadcast %563 : vector<8x1xi32> to vector<8x8xi32>
    %565 = arith.cmpi eq, %0, %564 : vector<8x8xi32>
    %566 = arith.extui %565 : vector<8x8xi1> to vector<8x8xi32>
    %567 = arith.sitofp %566 : vector<8x8xi32> to vector<8x8xf32>
    %c0_211 = arith.constant 0 : index
    %c0_212 = arith.constant 0 : index
    %568 = vector.load %arg1[%c0_211, %c0_212] : memref<8x48xf32, #tpu.memory_space<vmem>>, vector<8x48xf32>
    %cst_213 = arith.constant dense<0.000000e+00> : vector<8x48xf32>
    %569 = tpu.matmul %567, %568, %cst_213 {dimension_numbers = #tpu.dot_dimension_numbers<[1], [0], [0], [1], [0, 0, 1, 1], [], []>} : vector<8x8xf32>, vector<8x48xf32>, vector<8x48xf32> -> vector<8x48xf32>
    %c0_214 = arith.constant 0 : index
    %c0_215 = arith.constant 0 : index
    %570 = vector.load %arg2[%c0_214, %c0_215] : memref<1x48xf32, #tpu.memory_space<vmem>>, vector<1x48xf32>
    %571 = vector.broadcast %570 : vector<1x48xf32> to vector<8x48xf32>
    %572 = arith.addf %569, %571 : vector<8x48xf32>
    %c0_216 = arith.constant 0 : index
    %c0_217 = arith.constant 0 : index
    %573 = vector.load %arg3[%c0_216, %c0_217] : memref<16x48xf32, #tpu.memory_space<vmem>>, vector<16x48xf32>
    %cst_218 = arith.constant dense<0.000000e+00> : vector<8x48xf32>
    %574 = tpu.matmul %512, %573, %cst_218 {dimension_numbers = #tpu.dot_dimension_numbers<[1], [0], [0], [1], [0, 0, 1, 1], [], []>} : vector<8x16xf32>, vector<16x48xf32>, vector<8x48xf32> -> vector<8x48xf32>
    %c0_219 = arith.constant 0 : index
    %c0_220 = arith.constant 0 : index
    %575 = vector.load %arg4[%c0_219, %c0_220] : memref<1x48xf32, #tpu.memory_space<vmem>>, vector<1x48xf32>
    %576 = vector.broadcast %575 : vector<1x48xf32> to vector<8x48xf32>
    %577 = arith.addf %574, %576 : vector<8x48xf32>
    %578 = vector.extract_strided_slice %572 {offsets = [0, 0], sizes = [8, 16], strides = [1, 1]} : vector<8x48xf32> to vector<8x16xf32>
    %579 = vector.extract_strided_slice %577 {offsets = [0, 0], sizes = [8, 16], strides = [1, 1]} : vector<8x48xf32> to vector<8x16xf32>
    %580 = arith.addf %578, %579 : vector<8x16xf32>
    %581 = arith.negf %580 : vector<8x16xf32>
    %582 = math.exp %581 : vector<8x16xf32>
    %cst_221 = arith.constant 1.000000e+00 : f32
    %583 = vector.broadcast %cst_221 : f32 to vector<8x16xf32>
    %584 = arith.addf %583, %582 : vector<8x16xf32>
    %585 = arith.divf %583, %584 : vector<8x16xf32>
    %586 = vector.extract_strided_slice %572 {offsets = [0, 16], sizes = [8, 16], strides = [1, 1]} : vector<8x48xf32> to vector<8x16xf32>
    %587 = vector.extract_strided_slice %577 {offsets = [0, 16], sizes = [8, 16], strides = [1, 1]} : vector<8x48xf32> to vector<8x16xf32>
    %588 = arith.addf %586, %587 : vector<8x16xf32>
    %589 = arith.negf %588 : vector<8x16xf32>
    %590 = math.exp %589 : vector<8x16xf32>
    %cst_222 = arith.constant 1.000000e+00 : f32
    %591 = vector.broadcast %cst_222 : f32 to vector<8x16xf32>
    %592 = arith.addf %591, %590 : vector<8x16xf32>
    %593 = arith.divf %591, %592 : vector<8x16xf32>
    %594 = vector.extract_strided_slice %572 {offsets = [0, 32], sizes = [8, 16], strides = [1, 1]} : vector<8x48xf32> to vector<8x16xf32>
    %595 = vector.extract_strided_slice %577 {offsets = [0, 32], sizes = [8, 16], strides = [1, 1]} : vector<8x48xf32> to vector<8x16xf32>
    %596 = arith.mulf %585, %595 : vector<8x16xf32>
    %597 = arith.addf %594, %596 : vector<8x16xf32>
    %598 = math.tanh %597 : vector<8x16xf32>
    %cst_223 = arith.constant 1.000000e+00 : f32
    %599 = vector.broadcast %cst_223 : f32 to vector<8x16xf32>
    %600 = arith.subf %599, %593 : vector<8x16xf32>
    %601 = arith.mulf %600, %598 : vector<8x16xf32>
    %602 = arith.mulf %593, %512 : vector<8x16xf32>
    %603 = arith.addf %601, %602 : vector<8x16xf32>
    %604 = vector.shape_cast %552 : vector<8x1xi1> to vector<8x1xi1>
    %605 = vector.broadcast %604 : vector<8x1xi1> to vector<8x16xi1>
    %606 = arith.select %605, %603, %512 : vector<8x16xi1>, vector<8x16xf32>
    %607 = vector.shape_cast %552 : vector<8x1xi1> to vector<8x1xi1>
    %608 = vector.broadcast %607 : vector<8x1xi1> to vector<8x16xi1>
    %609 = arith.select %608, %603, %515 : vector<8x16xi1>, vector<8x16xf32>
    %c6_i32 = arith.constant 6 : i32
    %610 = arith.index_cast %c6_i32 : i32 to index
    %c0_224 = arith.constant 0 : index
    %c0_225 = arith.constant 0 : index
    %611 = vector.load %arg0[%610, %c0_224, %c0_225] : memref<8x8x16xf32, #tpu.memory_space<vmem>>, vector<1x8x16xf32>
    %612 = vector.shape_cast %611 : vector<1x8x16xf32> to vector<8x16xf32>
    %613 = arith.addf %612, %609 : vector<8x16xf32>
    %c0_226 = arith.constant 0 : index
    %c0_227 = arith.constant 0 : index
    %614 = vector.load %arg5[%c0_226, %c0_227] : memref<16x16xf32, #tpu.memory_space<vmem>>, vector<16x16xf32>
    %cst_228 = arith.constant dense<0.000000e+00> : vector<8x16xf32>
    %615 = tpu.matmul %613, %614, %cst_228 {dimension_numbers = #tpu.dot_dimension_numbers<[1], [0], [0], [1], [0, 0, 1, 1], [], []>} : vector<8x16xf32>, vector<16x16xf32>, vector<8x16xf32> -> vector<8x16xf32>
    %c0_229 = arith.constant 0 : index
    %c0_230 = arith.constant 0 : index
    %616 = vector.load %arg6[%c0_229, %c0_230] : memref<1x16xf32, #tpu.memory_space<vmem>>, vector<1x16xf32>
    %617 = vector.broadcast %616 : vector<1x16xf32> to vector<8x16xf32>
    %618 = arith.addf %615, %617 : vector<8x16xf32>
    %cst_231 = arith.constant 0.000000e+00 : f32
    %619 = vector.broadcast %cst_231 : f32 to vector<8x16xf32>
    %620 = arith.cmpf oge, %618, %619 : vector<8x16xf32>
    %cst_232 = arith.constant 0.00999999977 : f32
    %621 = vector.broadcast %cst_232 : f32 to vector<8x16xf32>
    %622 = arith.mulf %621, %618 : vector<8x16xf32>
    %623 = arith.select %620, %618, %622 : vector<8x16xi1>, vector<8x16xf32>
    %c0_233 = arith.constant 0 : index
    %c0_234 = arith.constant 0 : index
    %624 = vector.load %arg7[%c0_233, %c0_234] : memref<16x8xf32, #tpu.memory_space<vmem>>, vector<16x8xf32>
    %cst_235 = arith.constant dense<0.000000e+00> : vector<8x8xf32>
    %625 = tpu.matmul %623, %624, %cst_235 {dimension_numbers = #tpu.dot_dimension_numbers<[1], [0], [0], [1], [0, 0, 1, 1], [], []>} : vector<8x16xf32>, vector<16x8xf32>, vector<8x8xf32> -> vector<8x8xf32>
    %c0_236 = arith.constant 0 : index
    %c0_237 = arith.constant 0 : index
    %626 = vector.load %arg8[%c0_236, %c0_237] : memref<1x8xf32, #tpu.memory_space<vmem>>, vector<1x8xf32>
    %627 = vector.broadcast %626 : vector<1x8xf32> to vector<8x8xf32>
    %628 = arith.addf %625, %627 : vector<8x8xf32>
    %cst_238 = arith.constant dense<0xFF800000> : vector<8xf32>
    %629 = vector.multi_reduction <maximumf>, %628, %cst_238 [1] : vector<8x8xf32> to vector<8xf32>
    %630 = vector.shape_cast %629 : vector<8xf32> to vector<8x1xf32>
    %631 = vector.broadcast %630 : vector<8x1xf32> to vector<8x8xf32>
    %632 = arith.subf %628, %631 : vector<8x8xf32>
    %633 = math.exp %632 : vector<8x8xf32>
    %cst_239 = arith.constant dense<0.000000e+00> : vector<8xf32>
    %634 = vector.multi_reduction <add>, %633, %cst_239 [1] : vector<8x8xf32> to vector<8xf32>
    %635 = vector.shape_cast %634 : vector<8xf32> to vector<8x1xf32>
    %636 = math.log %635 : vector<8x1xf32>
    %cst_240 = arith.constant 0.000000e+00 : f32
    %637 = vector.broadcast %cst_240 : f32 to vector<8x1xf32>
    %638 = arith.subf %637, %636 : vector<8x1xf32>
    %639 = vector.broadcast %630 : vector<8x1xf32> to vector<8x8xf32>
    %640 = arith.cmpf oeq, %628, %639 : vector<8x8xf32>
    %c8_i32_241 = arith.constant 8 : i32
    %641 = vector.broadcast %c8_i32_241 : i32 to vector<8x8xi32>
    %642 = arith.select %640, %0, %641 : vector<8x8xi1>, vector<8x8xi32>
    %cst_242 = arith.constant dense<2147483647> : vector<8xi32>
    %643 = vector.multi_reduction <minsi>, %642, %cst_242 [1] : vector<8x8xi32> to vector<8xi32>
    %644 = vector.shape_cast %643 : vector<8xi32> to vector<8x1xi32>
    %c0_i32_243 = arith.constant 0 : i32
    %645 = vector.broadcast %c0_i32_243 : i32 to vector<8x1xi32>
    %646 = arith.cmpi ne, %644, %645 : vector<8x1xi32>
    %c0_i32_244 = arith.constant 0 : i32
    %647 = vector.broadcast %c0_i32_244 : i32 to vector<8x1xi32>
    %648 = arith.select %646, %644, %647 : vector<8x1xi1>, vector<8x1xi32>
    %649 = vector.broadcast %c6_i32 : i32 to vector<8x8xi32>
    %650 = arith.cmpi eq, %1, %649 : vector<8x8xi32>
    %651 = vector.shape_cast %648 : vector<8x1xi32> to vector<8x1xi32>
    %652 = vector.broadcast %651 : vector<8x1xi32> to vector<8x8xi32>
    %653 = arith.select %650, %652, %559 : vector<8x8xi1>, vector<8x8xi32>
    %cst_245 = arith.constant 0.000000e+00 : f32
    %654 = vector.broadcast %cst_245 : f32 to vector<8x1xf32>
    %655 = arith.select %646, %638, %654 : vector<8x1xi1>, vector<8x1xf32>
    %656 = arith.addf %562, %655 : vector<8x1xf32>
    %657 = arith.select %646, %644, %563 : vector<8x1xi1>, vector<8x1xi32>
    %658 = vector.broadcast %657 : vector<8x1xi32> to vector<8x8xi32>
    %659 = arith.cmpi eq, %0, %658 : vector<8x8xi32>
    %660 = arith.extui %659 : vector<8x8xi1> to vector<8x8xi32>
    %661 = arith.sitofp %660 : vector<8x8xi32> to vector<8x8xf32>
    %c0_246 = arith.constant 0 : index
    %c0_247 = arith.constant 0 : index
    %662 = vector.load %arg1[%c0_246, %c0_247] : memref<8x48xf32, #tpu.memory_space<vmem>>, vector<8x48xf32>
    %cst_248 = arith.constant dense<0.000000e+00> : vector<8x48xf32>
    %663 = tpu.matmul %661, %662, %cst_248 {dimension_numbers = #tpu.dot_dimension_numbers<[1], [0], [0], [1], [0, 0, 1, 1], [], []>} : vector<8x8xf32>, vector<8x48xf32>, vector<8x48xf32> -> vector<8x48xf32>
    %c0_249 = arith.constant 0 : index
    %c0_250 = arith.constant 0 : index
    %664 = vector.load %arg2[%c0_249, %c0_250] : memref<1x48xf32, #tpu.memory_space<vmem>>, vector<1x48xf32>
    %665 = vector.broadcast %664 : vector<1x48xf32> to vector<8x48xf32>
    %666 = arith.addf %663, %665 : vector<8x48xf32>
    %c0_251 = arith.constant 0 : index
    %c0_252 = arith.constant 0 : index
    %667 = vector.load %arg3[%c0_251, %c0_252] : memref<16x48xf32, #tpu.memory_space<vmem>>, vector<16x48xf32>
    %cst_253 = arith.constant dense<0.000000e+00> : vector<8x48xf32>
    %668 = tpu.matmul %606, %667, %cst_253 {dimension_numbers = #tpu.dot_dimension_numbers<[1], [0], [0], [1], [0, 0, 1, 1], [], []>} : vector<8x16xf32>, vector<16x48xf32>, vector<8x48xf32> -> vector<8x48xf32>
    %c0_254 = arith.constant 0 : index
    %c0_255 = arith.constant 0 : index
    %669 = vector.load %arg4[%c0_254, %c0_255] : memref<1x48xf32, #tpu.memory_space<vmem>>, vector<1x48xf32>
    %670 = vector.broadcast %669 : vector<1x48xf32> to vector<8x48xf32>
    %671 = arith.addf %668, %670 : vector<8x48xf32>
    %672 = vector.extract_strided_slice %666 {offsets = [0, 0], sizes = [8, 16], strides = [1, 1]} : vector<8x48xf32> to vector<8x16xf32>
    %673 = vector.extract_strided_slice %671 {offsets = [0, 0], sizes = [8, 16], strides = [1, 1]} : vector<8x48xf32> to vector<8x16xf32>
    %674 = arith.addf %672, %673 : vector<8x16xf32>
    %675 = arith.negf %674 : vector<8x16xf32>
    %676 = math.exp %675 : vector<8x16xf32>
    %cst_256 = arith.constant 1.000000e+00 : f32
    %677 = vector.broadcast %cst_256 : f32 to vector<8x16xf32>
    %678 = arith.addf %677, %676 : vector<8x16xf32>
    %679 = arith.divf %677, %678 : vector<8x16xf32>
    %680 = vector.extract_strided_slice %666 {offsets = [0, 16], sizes = [8, 16], strides = [1, 1]} : vector<8x48xf32> to vector<8x16xf32>
    %681 = vector.extract_strided_slice %671 {offsets = [0, 16], sizes = [8, 16], strides = [1, 1]} : vector<8x48xf32> to vector<8x16xf32>
    %682 = arith.addf %680, %681 : vector<8x16xf32>
    %683 = arith.negf %682 : vector<8x16xf32>
    %684 = math.exp %683 : vector<8x16xf32>
    %cst_257 = arith.constant 1.000000e+00 : f32
    %685 = vector.broadcast %cst_257 : f32 to vector<8x16xf32>
    %686 = arith.addf %685, %684 : vector<8x16xf32>
    %687 = arith.divf %685, %686 : vector<8x16xf32>
    %688 = vector.extract_strided_slice %666 {offsets = [0, 32], sizes = [8, 16], strides = [1, 1]} : vector<8x48xf32> to vector<8x16xf32>
    %689 = vector.extract_strided_slice %671 {offsets = [0, 32], sizes = [8, 16], strides = [1, 1]} : vector<8x48xf32> to vector<8x16xf32>
    %690 = arith.mulf %679, %689 : vector<8x16xf32>
    %691 = arith.addf %688, %690 : vector<8x16xf32>
    %692 = math.tanh %691 : vector<8x16xf32>
    %cst_258 = arith.constant 1.000000e+00 : f32
    %693 = vector.broadcast %cst_258 : f32 to vector<8x16xf32>
    %694 = arith.subf %693, %687 : vector<8x16xf32>
    %695 = arith.mulf %694, %692 : vector<8x16xf32>
    %696 = arith.mulf %687, %606 : vector<8x16xf32>
    %697 = arith.addf %695, %696 : vector<8x16xf32>
    %698 = vector.shape_cast %646 : vector<8x1xi1> to vector<8x1xi1>
    %699 = vector.broadcast %698 : vector<8x1xi1> to vector<8x16xi1>
    %700 = arith.select %699, %697, %606 : vector<8x16xi1>, vector<8x16xf32>
    %701 = vector.shape_cast %646 : vector<8x1xi1> to vector<8x1xi1>
    %702 = vector.broadcast %701 : vector<8x1xi1> to vector<8x16xi1>
    %703 = arith.select %702, %697, %609 : vector<8x16xi1>, vector<8x16xf32>
    %c7_i32 = arith.constant 7 : i32
    %704 = arith.index_cast %c7_i32 : i32 to index
    %c0_259 = arith.constant 0 : index
    %c0_260 = arith.constant 0 : index
    %705 = vector.load %arg0[%704, %c0_259, %c0_260] : memref<8x8x16xf32, #tpu.memory_space<vmem>>, vector<1x8x16xf32>
    %706 = vector.shape_cast %705 : vector<1x8x16xf32> to vector<8x16xf32>
    %707 = arith.addf %706, %703 : vector<8x16xf32>
    %c0_261 = arith.constant 0 : index
    %c0_262 = arith.constant 0 : index
    %708 = vector.load %arg5[%c0_261, %c0_262] : memref<16x16xf32, #tpu.memory_space<vmem>>, vector<16x16xf32>
    %cst_263 = arith.constant dense<0.000000e+00> : vector<8x16xf32>
    %709 = tpu.matmul %707, %708, %cst_263 {dimension_numbers = #tpu.dot_dimension_numbers<[1], [0], [0], [1], [0, 0, 1, 1], [], []>} : vector<8x16xf32>, vector<16x16xf32>, vector<8x16xf32> -> vector<8x16xf32>
    %c0_264 = arith.constant 0 : index
    %c0_265 = arith.constant 0 : index
    %710 = vector.load %arg6[%c0_264, %c0_265] : memref<1x16xf32, #tpu.memory_space<vmem>>, vector<1x16xf32>
    %711 = vector.broadcast %710 : vector<1x16xf32> to vector<8x16xf32>
    %712 = arith.addf %709, %711 : vector<8x16xf32>
    %cst_266 = arith.constant 0.000000e+00 : f32
    %713 = vector.broadcast %cst_266 : f32 to vector<8x16xf32>
    %714 = arith.cmpf oge, %712, %713 : vector<8x16xf32>
    %cst_267 = arith.constant 0.00999999977 : f32
    %715 = vector.broadcast %cst_267 : f32 to vector<8x16xf32>
    %716 = arith.mulf %715, %712 : vector<8x16xf32>
    %717 = arith.select %714, %712, %716 : vector<8x16xi1>, vector<8x16xf32>
    %c0_268 = arith.constant 0 : index
    %c0_269 = arith.constant 0 : index
    %718 = vector.load %arg7[%c0_268, %c0_269] : memref<16x8xf32, #tpu.memory_space<vmem>>, vector<16x8xf32>
    %cst_270 = arith.constant dense<0.000000e+00> : vector<8x8xf32>
    %719 = tpu.matmul %717, %718, %cst_270 {dimension_numbers = #tpu.dot_dimension_numbers<[1], [0], [0], [1], [0, 0, 1, 1], [], []>} : vector<8x16xf32>, vector<16x8xf32>, vector<8x8xf32> -> vector<8x8xf32>
    %c0_271 = arith.constant 0 : index
    %c0_272 = arith.constant 0 : index
    %720 = vector.load %arg8[%c0_271, %c0_272] : memref<1x8xf32, #tpu.memory_space<vmem>>, vector<1x8xf32>
    %721 = vector.broadcast %720 : vector<1x8xf32> to vector<8x8xf32>
    %722 = arith.addf %719, %721 : vector<8x8xf32>
    %cst_273 = arith.constant dense<0xFF800000> : vector<8xf32>
    %723 = vector.multi_reduction <maximumf>, %722, %cst_273 [1] : vector<8x8xf32> to vector<8xf32>
    %724 = vector.shape_cast %723 : vector<8xf32> to vector<8x1xf32>
    %725 = vector.broadcast %724 : vector<8x1xf32> to vector<8x8xf32>
    %726 = arith.subf %722, %725 : vector<8x8xf32>
    %727 = math.exp %726 : vector<8x8xf32>
    %cst_274 = arith.constant dense<0.000000e+00> : vector<8xf32>
    %728 = vector.multi_reduction <add>, %727, %cst_274 [1] : vector<8x8xf32> to vector<8xf32>
    %729 = vector.shape_cast %728 : vector<8xf32> to vector<8x1xf32>
    %730 = math.log %729 : vector<8x1xf32>
    %cst_275 = arith.constant 0.000000e+00 : f32
    %731 = vector.broadcast %cst_275 : f32 to vector<8x1xf32>
    %732 = arith.subf %731, %730 : vector<8x1xf32>
    %733 = vector.broadcast %724 : vector<8x1xf32> to vector<8x8xf32>
    %734 = arith.cmpf oeq, %722, %733 : vector<8x8xf32>
    %c8_i32_276 = arith.constant 8 : i32
    %735 = vector.broadcast %c8_i32_276 : i32 to vector<8x8xi32>
    %736 = arith.select %734, %0, %735 : vector<8x8xi1>, vector<8x8xi32>
    %cst_277 = arith.constant dense<2147483647> : vector<8xi32>
    %737 = vector.multi_reduction <minsi>, %736, %cst_277 [1] : vector<8x8xi32> to vector<8xi32>
    %738 = vector.shape_cast %737 : vector<8xi32> to vector<8x1xi32>
    %c0_i32_278 = arith.constant 0 : i32
    %739 = vector.broadcast %c0_i32_278 : i32 to vector<8x1xi32>
    %740 = arith.cmpi ne, %738, %739 : vector<8x1xi32>
    %c0_i32_279 = arith.constant 0 : i32
    %741 = vector.broadcast %c0_i32_279 : i32 to vector<8x1xi32>
    %742 = arith.select %740, %738, %741 : vector<8x1xi1>, vector<8x1xi32>
    %743 = vector.broadcast %c7_i32 : i32 to vector<8x8xi32>
    %744 = arith.cmpi eq, %1, %743 : vector<8x8xi32>
    %745 = vector.shape_cast %742 : vector<8x1xi32> to vector<8x1xi32>
    %746 = vector.broadcast %745 : vector<8x1xi32> to vector<8x8xi32>
    %747 = arith.select %744, %746, %653 : vector<8x8xi1>, vector<8x8xi32>
    %cst_280 = arith.constant 0.000000e+00 : f32
    %748 = vector.broadcast %cst_280 : f32 to vector<8x1xf32>
    %749 = arith.select %740, %732, %748 : vector<8x1xi1>, vector<8x1xf32>
    %750 = arith.addf %656, %749 : vector<8x1xf32>
    %751 = arith.select %740, %738, %657 : vector<8x1xi1>, vector<8x1xi32>
    %752 = vector.broadcast %751 : vector<8x1xi32> to vector<8x8xi32>
    %753 = arith.cmpi eq, %0, %752 : vector<8x8xi32>
    %754 = arith.extui %753 : vector<8x8xi1> to vector<8x8xi32>
    %755 = arith.sitofp %754 : vector<8x8xi32> to vector<8x8xf32>
    %c0_281 = arith.constant 0 : index
    %c0_282 = arith.constant 0 : index
    %756 = vector.load %arg1[%c0_281, %c0_282] : memref<8x48xf32, #tpu.memory_space<vmem>>, vector<8x48xf32>
    %cst_283 = arith.constant dense<0.000000e+00> : vector<8x48xf32>
    %757 = tpu.matmul %755, %756, %cst_283 {dimension_numbers = #tpu.dot_dimension_numbers<[1], [0], [0], [1], [0, 0, 1, 1], [], []>} : vector<8x8xf32>, vector<8x48xf32>, vector<8x48xf32> -> vector<8x48xf32>
    %c0_284 = arith.constant 0 : index
    %c0_285 = arith.constant 0 : index
    %758 = vector.load %arg2[%c0_284, %c0_285] : memref<1x48xf32, #tpu.memory_space<vmem>>, vector<1x48xf32>
    %759 = vector.broadcast %758 : vector<1x48xf32> to vector<8x48xf32>
    %760 = arith.addf %757, %759 : vector<8x48xf32>
    %c0_286 = arith.constant 0 : index
    %c0_287 = arith.constant 0 : index
    %761 = vector.load %arg3[%c0_286, %c0_287] : memref<16x48xf32, #tpu.memory_space<vmem>>, vector<16x48xf32>
    %cst_288 = arith.constant dense<0.000000e+00> : vector<8x48xf32>
    %762 = tpu.matmul %700, %761, %cst_288 {dimension_numbers = #tpu.dot_dimension_numbers<[1], [0], [0], [1], [0, 0, 1, 1], [], []>} : vector<8x16xf32>, vector<16x48xf32>, vector<8x48xf32> -> vector<8x48xf32>
    %c0_289 = arith.constant 0 : index
    %c0_290 = arith.constant 0 : index
    %763 = vector.load %arg4[%c0_289, %c0_290] : memref<1x48xf32, #tpu.memory_space<vmem>>, vector<1x48xf32>
    %764 = vector.broadcast %763 : vector<1x48xf32> to vector<8x48xf32>
    %765 = arith.addf %762, %764 : vector<8x48xf32>
    %766 = vector.extract_strided_slice %760 {offsets = [0, 0], sizes = [8, 16], strides = [1, 1]} : vector<8x48xf32> to vector<8x16xf32>
    %767 = vector.extract_strided_slice %765 {offsets = [0, 0], sizes = [8, 16], strides = [1, 1]} : vector<8x48xf32> to vector<8x16xf32>
    %768 = arith.addf %766, %767 : vector<8x16xf32>
    %769 = arith.negf %768 : vector<8x16xf32>
    %770 = math.exp %769 : vector<8x16xf32>
    %cst_291 = arith.constant 1.000000e+00 : f32
    %771 = vector.broadcast %cst_291 : f32 to vector<8x16xf32>
    %772 = arith.addf %771, %770 : vector<8x16xf32>
    %773 = arith.divf %771, %772 : vector<8x16xf32>
    %774 = vector.extract_strided_slice %760 {offsets = [0, 16], sizes = [8, 16], strides = [1, 1]} : vector<8x48xf32> to vector<8x16xf32>
    %775 = vector.extract_strided_slice %765 {offsets = [0, 16], sizes = [8, 16], strides = [1, 1]} : vector<8x48xf32> to vector<8x16xf32>
    %776 = arith.addf %774, %775 : vector<8x16xf32>
    %777 = arith.negf %776 : vector<8x16xf32>
    %778 = math.exp %777 : vector<8x16xf32>
    %cst_292 = arith.constant 1.000000e+00 : f32
    %779 = vector.broadcast %cst_292 : f32 to vector<8x16xf32>
    %780 = arith.addf %779, %778 : vector<8x16xf32>
    %781 = arith.divf %779, %780 : vector<8x16xf32>
    %782 = vector.extract_strided_slice %760 {offsets = [0, 32], sizes = [8, 16], strides = [1, 1]} : vector<8x48xf32> to vector<8x16xf32>
    %783 = vector.extract_strided_slice %765 {offsets = [0, 32], sizes = [8, 16], strides = [1, 1]} : vector<8x48xf32> to vector<8x16xf32>
    %784 = arith.mulf %773, %783 : vector<8x16xf32>
    %785 = arith.addf %782, %784 : vector<8x16xf32>
    %786 = math.tanh %785 : vector<8x16xf32>
    %cst_293 = arith.constant 1.000000e+00 : f32
    %787 = vector.broadcast %cst_293 : f32 to vector<8x16xf32>
    %788 = arith.subf %787, %781 : vector<8x16xf32>
    %789 = arith.mulf %788, %786 : vector<8x16xf32>
    %790 = arith.mulf %781, %700 : vector<8x16xf32>
    %791 = arith.addf %789, %790 : vector<8x16xf32>
    %792 = vector.shape_cast %740 : vector<8x1xi1> to vector<8x1xi1>
    %793 = vector.broadcast %792 : vector<8x1xi1> to vector<8x16xi1>
    %794 = arith.select %793, %791, %700 : vector<8x16xi1>, vector<8x16xf32>
    %795 = vector.shape_cast %740 : vector<8x1xi1> to vector<8x1xi1>
    %796 = vector.broadcast %795 : vector<8x1xi1> to vector<8x16xi1>
    %797 = arith.select %796, %791, %703 : vector<8x16xi1>, vector<8x16xf32>
    %c8_i32_294 = arith.constant 8 : i32
    %c0_295 = arith.constant 0 : index
    %c0_296 = arith.constant 0 : index
    %798 = vector.load %arg9[%c0_295, %c0_296] : memref<8x8xi32, #tpu.memory_space<vmem>>, vector<8x8xi32>
    tpu.vector_store %arg9[%c0_295, %c0_296], %747 {strides = array<i32>} : memref<8x8xi32, #tpu.memory_space<vmem>>, vector<8x8xi32>,
    %c0_297 = arith.constant 0 : index
    %c0_298 = arith.constant 0 : index
    %799 = vector.load %arg10[%c0_297, %c0_298] : memref<8x1xf32, #tpu.memory_space<vmem>>, vector<8x1xf32>
    tpu.vector_store %arg10[%c0_297, %c0_298], %750 {strides = array<i32>} : memref<8x1xf32, #tpu.memory_space<vmem>>, vector<8x1xf32>,
    return
  }
}

</mosaic_0001>

<bundles_post_ra>
// kernel: tpu_custom_call.1
= control target key start
LH: loop header
LB: loop body
LE: loop exit
PB: predicated region body
PF: predicated region fallthrough
CT: control target
= control target key end

     0   :  { %16 = vsyncpa [#allocation3], 0  ;;  %s4320_s0 = inlined_call_operand.hbm [shape: f32[8,8,16], index: 0, kind: input, shape index: {}]   ;;  %s4321_s1 = inlined_call_operand.hbm [shape: f32[8,48], index: 1, kind: input, shape index: {}]   ;;  %s4322_s2 = inlined_call_operand.vmem [shape: f32[1,48], index: 2, kind: input, shape index: {}]   ;;  %s4323_s3 = inlined_call_operand.vmem [shape: f32[16,48], index: 3, kind: input, shape index: {}]   ;;  %s4324_s4 = inlined_call_operand.hbm [shape: f32[1,48], index: 4, kind: input, shape index: {}]   ;;  %s4325_s5 = inlined_call_operand.vmem [shape: f32[16,16], index: 5, kind: input, shape index: {}]   ;;  %s4326_s6 = inlined_call_operand.vmem [shape: f32[1,16], index: 6, kind: input, shape index: {}]   ;;  %s4327_s7 = inlined_call_operand.vmem [shape: f32[16,8], index: 7, kind: input, shape index: {}]   ;;  %s4328_s8 = inlined_call_operand.vmem [shape: f32[1,8], index: 8, kind: input, shape index: {}]   ;;  %s4329_s9 = inlined_call_operand.hbm [shape: s32[8,8], index: 9, kind: output, shape index: {0}]   ;;  %s4330_s10 = inlined_call_operand.vmem [shape: f32[8,1], index: 10, kind: output, shape index: {1}]  }
   0x1   :  { %17 = vsyncpa [#allocation6], 0 }
   0x2   :  { %18 = vsyncpa [#allocation4], 0  ;;  %s3607_s13 = smov [#allocation5]   ;;  %s3608_s15 = smov [#allocation2]  }
   0x3   :  { %s37_s14 = sshll.u32 %s3607_s13, 4  ;;  %s24_s16 = sshll.u32 %s3608_s15, 4  ;;  %s38_s14 = int_to_ptr.vmem [resolvable:$true] %s37_s14  ;;  %s25_s16 = int_to_ptr.vmem [resolvable:$true] %s24_s16 }
   0x4   :  { %s3529_s17 = scalar_lea.vmem %s38_s14, 128  ;;  %p3534_p1 = scmp.lt.s32.totalorder %s38_s14, %s38_s14 }
   0x5   :  { %p3530_p0 = scmp.ne.s32.totalorder %s38_s14, %s3529_s17  ;;  %p3535_p2 = scmp.lt.s32.totalorder %s3529_s17, %s3529_s17 }
   0x7   :  { %p3536_p3 = por %p3535_p2, %p3534_p1 }
   0x9   :  { %p3537_p4 = pnand %p3536_p3, %p3530_p0 }
   0xb   :  { %3540 = shalt.err (!%p3537_p4)
}
   0xc   :  { %40 = dma.hbm_to_vmem [thread:$0]  %s4321_s1, 128, %s38_s14, [#allocation6]  }
   0xd   :  { %s3549_s20 = scalar_lea.vmem %s25_s16, 1024  ;;  %p3554_p6 = scmp.lt.s32.totalorder %s25_s16, %s25_s16 }
   0xe   :  { %p3550_p5 = scmp.ne.s32.totalorder %s25_s16, %s3549_s20  ;;  %p3555_p7 = scmp.lt.s32.totalorder %s3549_s20, %s3549_s20 }
  0x10   :  { %p3556_p8 = por %p3555_p7, %p3554_p6 }
  0x12   :  { %p3557_p9 = pnand %p3556_p8, %p3550_p5 }
  0x14   :  { %3560 = shalt.err (!%p3557_p9)
}
  0x15   :  { %s3609_s21 = smov 128   ;;  %s3610_s22 = smov 8  }
  0x16   :  { %30 = dma.hbm_to_vmem [thread:$0]  %s4320_s0, 1024, %s25_s16, [#allocation3], %s3609_s21, %s3609_s21, %s3610_s22  }
  0x17   :  { %s3611_s25 = smov [#allocation7]  }
  0x18   :  { %s51_s26 = sshll.u32 %s3611_s25, 4  ;;  %s52_s26 = int_to_ptr.vmem [resolvable:$true] %s51_s26 }
  0x19   :  { %s3569_s27 = scalar_lea.vmem %s52_s26, 16  ;;  %s3573_s28 = scalar_lea.vmem %s52_s26, 32 }
  0x1a   :  { %p3570_p10 = scmp.ne.s32.totalorder %s52_s26, %s3569_s27  ;;  %p3574_p11 = scmp.lt.s32.totalorder %s52_s26, %s52_s26 }
  0x1b   :  { %p3575_p12 = scmp.lt.s32.totalorder %s3573_s28, %s3569_s27 }
  0x1d   :  { %p3576_p13 = por %p3575_p12, %p3574_p11 }
  0x1f   :  { %p3577_p0 = pnand %p3576_p13, %p3570_p10 }
  0x21   :  { %3580 = shalt.err (!%p3577_p0)
}
  0x22   :  { %54 = dma.hbm_to_vmem [thread:$0]  %s4324_s4, 16, %s52_s26, [#allocation6]  }
  0x23   :  { %3601 = dma.done.wait [#allocation3], 1024  }
  0x24   :  { %3602 = vsyncadd [#allocation3], 4294966272 }
  0x25   :  { %3603 = dma.done.wait [#allocation6], 144  }
  0x26   :  { %3604 = vsyncadd [#allocation6], 4294967152  ;;  %v72_v0 = vlaneseq  ;;  %v3612_v1 = vmov 0.0   ;;  %vm3613_vm0 = vmmov 0   ;;  %vm85_vm2 = vcmask 64512   ;;  %v3697_v4 = vld [vmem:[%s4323_s3 + $0x8] sm:$0xff] }
  0x27   :  { %3216 = vmatprep.subr.mxu1 %v3612_v1  ;;  %3211 = vmatprep.subr.mxu0 %v3612_v1  ;;  %v3699_v5 = vld [vmem:[#allocation5] sm:$0xff]  ;;  %v3718_v8 = vld [vmem:[#allocation7] ss:$0 sm:$0xff]  ;;  %s3614_s12 = smov 96   ;;  %s3615_s15 = smov 32   ;;  %vm168_vm3 = vcmask 130048  }
  0x28   :  { %3213 = vmatprep.mubr.msk.f32.mxu0 %vm3613_vm0, %v3612_v1  ;;  %3220 = vmatprep.mubr.msk.f32.mxu1 %vm3613_vm0, %v3612_v1  ;;  %v3688_v2 = vand.u32 127, %v72_v0  ;;  %v3704_v6 = vld [vmem:[%s4323_s3] sm:$0xff]  ;;  %v3732_v24 = vld [vmem:[%s4325_s5 + $0x8] sm:$0xff]  ;;  %s3616_s18 = smov 112  }
  0x29   :  { %3217 = vmatpush3.msra.mxu1 %v3697_v4  ;;  %3212 = vmatpush3.msra.mxu0 %v3699_v5  ;;  %v3725_v13 = vld [vmem:[%s4322_s2] ss:$0 sm:$0xff]  ;;  %v3756_v35 = vld [vmem:[%s4327_s7 + $0x8] sm:$0xff] }
  0x2a   :  { %vm74_vm1 = vcmp.eq.s32.totalorder %v3688_v2, 0  ;;  %3218 = vmatprep.subr.mxu1 %v3612_v1  ;;  %3223 = vmatprep.subr.mxu0 %v3612_v1  ;;  %v3740_v26 = vld [vmem:[%s4325_s5] sm:$0xff] }
  0x2b   :  { %v3072_v3 = vsel %vm74_vm1, 1.0, %v3612_v1  ;;  %3219 = vmatpush3.msra.mxu1 %v3704_v6  ;;  %v268_v32 = vld [vmem:[#allocation2] sm:$0xff] }
  0x2c   :  { %3214 = vmatmul.mubr.msk.f32.vlgmr.msra.gmra.mxu0 %vm85_vm2, %v3072_v3  ;;  %3221 = vmatmul.mubr.f32.vlgmr.msra.gmra.mxu1 %v3612_v1  ;;  %v3763_v36 = vld [vmem:[%s4327_s7] sm:$0xff] }
  0x2d   :  { %3227 = vmatprep.mubr.msk.f32.mxu0 %vm3613_vm0, %v3612_v1  ;;  %3230 = vmatprep.subr.mxu1 %v3612_v1  ;;  %v3770_v37 = vld [vmem:[%s4326_s6] ss:$0 sm:$0xff] }
  0x2e   :  { %3234 = vmatprep.mubr.msk.f32.mxu1 %vm3613_vm0, %v3612_v1  ;;  %3224 = vmatpush3.msra.mxu0 %v3732_v24  ;;  %v3790_v43 = vld [vmem:[%s4328_s8] ss:$0 sm:$0xff] }
  0x2f   :  { %3225 = vmatprep.subr.mxu0 %v3612_v1  ;;  %3231 = vmatpush3.msra.mxu1 %v3756_v35 }
  0x30   :  { %3226 = vmatpush3.msra.mxu0 %v3740_v26  ;;  %3232 = vmatprep.subr.mxu1 %v3612_v1 }
  0x31   :  { %3237 = vmatprep.subr.mxu0 %v3612_v1  ;;  %3233 = vmatpush3.msra.mxu1 %v3763_v36 }
  0x32   :  { %3242 = vmatprep.subr.mxu1 %v3612_v1 }
  0xec   :  { %v155_v7 = vpop.f32.mrf.mxu0  ;;  %v238_v9 = vpop.f32.mrf.mxu1 }
  0xed   :  { %v239_v11 = vadd.f32 %v3718_v8, %v238_v9  ;;  %v156_v14 = vadd.f32 %v3725_v13, %v155_v7 }
  0xee   :  { %v3215_v10 = vpop.f32.mrf.mxu0  ;;  %v3222_v12 = vpop.f32.mrf.mxu1 }
  0xef   :  { %250 = vrot.lane.b32.xlu0 %v239_v11, %s3614_s12  ;;  %v242_v15 = vadd.f32 %v239_v11, %v156_v14 }
  0xf1   :  { %v3076_v16 = vmul.f32 -1.442695, %v242_v15 }
  0xf3   :  { %3430 = vpow2.f32 %v3076_v16 }
 0x100   :  { %v3431_v17 = vpop.eup %3430 }
 0x101   :  { %v246_v18 = vadd.f32 1.0, %v3431_v17 }
 0x103   :  { %3432 = vrcp.f32 %v246_v18 }
 0x110   :  { %v3433_v19 = vpop.eup %3432 }
 0x111   :  { %v260_v27 = vsub.f32 1.0, %v3433_v19  ;;  %v266_v29 = vmul.f32 0.0, %v3433_v19 }
 0x161   :  { %v251_v20 = vpop.permute.xlu0 %250 }
 0x162   :  { %v253_v21 = vmul.f32 %v3433_v19, %v251_v20 }
 0x164   :  { %255 = vrot.lane.b32.xlu0 %v253_v21, %s3615_s15 }
 0x1d6   :  { %v256_v22 = vpop.permute.xlu0 %255 }
 0x1d7   :  { %v258_v23 = vadd.f32 %v256_v22, %v156_v14 }
 0x1d9   :  { %3434 = vtanh.f32 %v258_v23 }
 0x1e6   :  { %v3435_v25 = vpop.eup %3434 }
 0x1e7   :  { %262 = vrot.lane.b32.xlu1 %v3435_v25, %s3616_s18 }
 0x259   :  { %v263_v28 = vpop.permute.xlu1 %262 }
 0x25a   :  { %v265_v30 = vmul.f32 %v263_v28, %v260_v27 }
 0x25c   :  { %v3744_v31 = vadd.f32 %v266_v29, %v265_v30  ;;  %v652_v30 = vld [vmem:[#allocation2 + $0x8] sm:$0xff] }
 0x25e   :  { %270 = vrot.lane.b32.xlu1 %v3744_v31, %s3616_s18 }
 0x2d0   :  { %v271_v33 = vpop.permute.xlu1 %270 }
 0x2d1   :  { %v273_v34 = vadd.f32 %v271_v33, %v268_v32 }
 0x2d3   :  { %3228 = vmatmul.mubr.msk.f32.vlgmr.msra.gmra.mxu0 %vm168_vm3, %v273_v34 }
 0x2d4   :  { %3238 = vmatpush3.msra.mxu0 %v3699_v5  ;;  %3239 = vmatprep.mubr.msk.f32.mxu0 %vm3613_vm0, %v3612_v1 }
 0x2d5   :  { %3249 = vmatprep.subr.mxu0 %v3612_v1 }
 0x393   :  { %v352_v38 = vpop.f32.mrf.mxu0 }
 0x394   :  { %v353_v39 = vadd.f32 %v3770_v37, %v352_v38 }
 0x395   :  { %v3229_v40 = vpop.f32.mrf.mxu0 }
 0x396   :  { %vm356_vm4 = vcmp.ge.f32.partialorder %v353_v39, 0.0  ;;  %v357_v41 = vmul.f32 0.01, %v353_v39 }
 0x398   :  { %v358_v42 = vsel %vm356_vm4, %v353_v39, %v357_v41 }
 0x399   :  { %3235 = vmatmul.mubr.msk.f32.vlgmr.msra.gmra.mxu1 %vm168_vm3, %v358_v42 }
 0x39a   :  { %3243 = vmatpush3.msra.mxu1 %v3697_v4  ;;  %3246 = vmatprep.mubr.msk.f32.mxu1 %vm3613_vm0, %v3612_v1 }
 0x39b   :  { %3244 = vmatprep.subr.mxu1 %v3612_v1 }
 0x39c   :  { %3245 = vmatpush3.msra.mxu1 %v3704_v6 }
 0x39d   :  { %3247 = vmatmul.mubr.msk.f32.vlgmr.msra.gmra.mxu1 %vm168_vm3, %v271_v33  ;;  %3256 = vmatprep.subr.mxu1 %v3612_v1 }
 0x39e   :  { %3257 = vmatpush3.msra.mxu1 %v3756_v35  ;;  %3260 = vmatprep.mubr.msk.f32.mxu1 %vm3613_vm0, %v3612_v1 }
 0x39f   :  { %3258 = vmatprep.subr.mxu1 %v3612_v1 }
 0x3a0   :  { %3259 = vmatpush3.msra.mxu1 %v3763_v36 }
 0x3a1   :  { %3268 = vmatprep.subr.mxu1 %v3612_v1 }
 0x459   :  { %v437_v44 = vpop.f32.mrf.mxu1 }
 0x45a   :  { %v3793_v45 = vadd.f32 %v3790_v43, %v437_v44 }
 0x45b   :  { %v3236_v46 = vpop.f32.mrf.mxu1 }
 0x45c   :  { %v441_v47 = vsel %vm85_vm2, %v3793_v45, -inf }
 0x45d   :  { %442 = vmax.xlane.f32.xlu0 %v441_v47  ;;  %v618_v48 = vpop.f32.mrf.mxu1 }
 0x45e   :  { %v619_v59 = vadd.f32 %v3718_v8, %v618_v48 }
 0x45f   :  { %v3248_v49 = vpop.f32.mrf.mxu1 }
 0x4e6   :  { %v3797_v50 = vpop.xlane.xlu0 %442 }
 0x4e7   :  { %vm453_vm5 = vcmp.eq.f32.partialorder %v3793_v45, %v3797_v50 }
 0x4e8   :  { %v454_v51 = vsel %vm453_vm5, %v3688_v2, 8  ;;  %vm837_vm5 = vcmp.eq.s32.totalorder %v3688_v2, 1 }
 0x4e9   :  { %v455_v52 = vsel %vm85_vm2, %v454_v51, 2147483647 }
 0x4ea   :  { %v457_v53 = vshra.s32 %v455_v52, 16  ;;  %v456_v55 = vand.u32 65535, %v455_v52 }
 0x4ec   :  { %v459_v54 = vcvt.s32.f32 %v457_v53  ;;  %v458_v57 = vcvt.s32.f32 %v456_v55 }
 0x4ee   :  { %460 = vmin.xlane.f32.xlu1 %v459_v54 }
 0x577   :  { %v461_v56 = vpop.xlane.xlu1 %460 }
 0x578   :  { %vm462_vm6 = vcmp.eq.f32.partialorder %v459_v54, %v461_v56  ;;  %v467_v60 = vcvt.f32.s32 %v461_v56 }
 0x579   :  { %v463_v58 = vsel %vm462_vm6, %v458_v57, inf  ;;  %vm1205_vm6 = vcmp.eq.s32.totalorder %v3688_v2, 2 }
 0x57a   :  { %464 = vmin.xlane.f32.xlu0 %v463_v58  ;;  %v468_v62 = vshll.u32 %v467_v60, 16 }
 0x590   :  { %630 = vrot.lane.b32.xlu0 %v619_v59, %s3614_s12 }
 0x603   :  { %v465_v61 = vpop.xlane.xlu0 %464 }
 0x604   :  { %v466_v63 = vcvt.f32.s32 %v465_v61 }
 0x606   :  { %v3805_v0 = vadd.s32 %v468_v62, %v466_v63 }
 0x607   :  { %v631_v17 = vpop.permute.xlu0 %630 }
 0x608   :  { %vm474_vm7 = vcmp.eq.s32.totalorder %v3688_v2, %v3805_v0  ;;  %vm470_vm8 = vcmp.ne.s32.totalorder %v3805_v0, 0 }
 0x609   :  { %v3081_v3 = vsel %vm474_vm7, 1.0, %v3612_v1 }
 0x60a   :  { %3240 = vmatmul.mubr.msk.f32.vlgmr.msra.gmra.mxu0 %vm85_vm2, %v3081_v3 }
 0x60b   :  { %3250 = vmatpush3.msra.mxu0 %v3732_v24  ;;  %3253 = vmatprep.mubr.msk.f32.mxu0 %vm3613_vm0, %v3612_v1 }
 0x60c   :  { %3251 = vmatprep.subr.mxu0 %v3612_v1 }
 0x60d   :  { %3252 = vmatpush3.msra.mxu0 %v3740_v26 }
 0x60e   :  { %3263 = vmatprep.subr.mxu0 %v3612_v1 }
 0x6ca   :  { %v546_v7 = vpop.f32.mrf.mxu0 }
 0x6cb   :  { %v547_v9 = vadd.f32 %v3725_v13, %v546_v7 }
 0x6cc   :  { %v3241_v10 = vpop.f32.mrf.mxu0 }
 0x6cd   :  { %v622_v11 = vadd.f32 %v619_v59, %v547_v9 }
 0x6cf   :  { %v3084_v12 = vmul.f32 -1.442695, %v622_v11 }
 0x6d1   :  { %3436 = vpow2.f32 %v3084_v12 }
 0x6de   :  { %v3437_v14 = vpop.eup %3436 }
 0x6df   :  { %v626_v15 = vadd.f32 1.0, %v3437_v14 }
 0x6e1   :  { %3438 = vrcp.f32 %v626_v15 }
 0x6ee   :  { %v3439_v16 = vpop.eup %3438 }
 0x6ef   :  { %v633_v18 = vmul.f32 %v3439_v16, %v631_v17  ;;  %v640_v22 = vsub.f32 1.0, %v3439_v16  ;;  %v646_v25 = vmul.f32 %v3439_v16, %v3744_v31 }
 0x6f1   :  { %635 = vrot.lane.b32.xlu1 %v633_v18, %s3615_s15 }
 0x763   :  { %v636_v19 = vpop.permute.xlu1 %635 }
 0x764   :  { %v638_v20 = vadd.f32 %v636_v19, %v547_v9 }
 0x766   :  { %3440 = vtanh.f32 %v638_v20 }
 0x773   :  { %v3441_v21 = vpop.eup %3440 }
 0x774   :  { %642 = vrot.lane.b32.xlu1 %v3441_v21, %s3616_s18 }
 0x7e6   :  { %v643_v23 = vpop.permute.xlu1 %642 }
 0x7e7   :  { %v645_v27 = vmul.f32 %v643_v23, %v640_v22 }
 0x7e9   :  { %v647_v28 = vadd.f32 %v646_v25, %v645_v27 }
 0x7eb   :  { %v3825_v29 = vsel %vm470_vm8, %v647_v28, %v3744_v31 }
 0x7ec   :  { %654 = vrot.lane.b32.xlu0 %v3825_v29, %s3616_s18 }
 0x85e   :  { %v655_v32 = vpop.permute.xlu0 %654 }
 0x85f   :  { %v657_v33 = vadd.f32 %v655_v32, %v652_v30 }
 0x861   :  { %3254 = vmatmul.mubr.msk.f32.vlgmr.msra.gmra.mxu0 %vm168_vm3, %v657_v33 }
 0x862   :  { %3264 = vmatpush3.msra.mxu0 %v3699_v5  ;;  %3265 = vmatprep.mubr.msk.f32.mxu0 %vm3613_vm0, %v3612_v1 }
 0x863   :  { %3275 = vmatprep.subr.mxu0 %v3612_v1 }
 0x921   :  { %v727_v34 = vpop.f32.mrf.mxu0 }
 0x922   :  { %v728_v38 = vadd.f32 %v3770_v37, %v727_v34  ;;  %v1020_v34 = vld [vmem:[#allocation2 + $0x10] sm:$0xff] }
 0x923   :  { %v3255_v31 = vpop.f32.mrf.mxu0 }
 0x924   :  { %vm731_vm9 = vcmp.ge.f32.partialorder %v728_v38, 0.0  ;;  %v732_v39 = vmul.f32 0.01, %v728_v38 }
 0x926   :  { %v733_v40 = vsel %vm731_vm9, %v728_v38, %v732_v39 }
 0x927   :  { %3261 = vmatmul.mubr.msk.f32.vlgmr.msra.gmra.mxu1 %vm168_vm3, %v733_v40 }
 0x928   :  { %3269 = vmatpush3.msra.mxu1 %v3697_v4  ;;  %3272 = vmatprep.mubr.msk.f32.mxu1 %vm3613_vm0, %v3612_v1 }
 0x929   :  { %3270 = vmatprep.subr.mxu1 %v3612_v1 }
 0x92a   :  { %3271 = vmatpush3.msra.mxu1 %v3704_v6 }
 0x92b   :  { %3273 = vmatmul.mubr.msk.f32.vlgmr.msra.gmra.mxu1 %vm168_vm3, %v655_v32  ;;  %3282 = vmatprep.subr.mxu1 %v3612_v1 }
 0x92c   :  { %3283 = vmatpush3.msra.mxu1 %v3756_v35  ;;  %3286 = vmatprep.mubr.msk.f32.mxu1 %vm3613_vm0, %v3612_v1 }
 0x92d   :  { %3284 = vmatprep.subr.mxu1 %v3612_v1 }
 0x92e   :  { %3285 = vmatpush3.msra.mxu1 %v3763_v36 }
 0x92f   :  { %3294 = vmatprep.subr.mxu1 %v3612_v1 }
 0x9e7   :  { %v803_v41 = vpop.f32.mrf.mxu1 }
 0x9e8   :  { %v3850_v42 = vadd.f32 %v3790_v43, %v803_v41 }
 0x9e9   :  { %v3262_v44 = vpop.f32.mrf.mxu1 }
 0x9ea   :  { %v807_v46 = vsel %vm85_vm2, %v3850_v42, -inf }
 0x9eb   :  { %808 = vmax.xlane.f32.xlu1 %v807_v46  ;;  %v986_v47 = vpop.f32.mrf.mxu1 }
 0x9ec   :  { %v987_v49 = vadd.f32 %v3718_v8, %v986_v47 }
 0x9ed   :  { %v3274_v48 = vpop.f32.mrf.mxu1 }
 0x9fc   :  { %998 = vrot.lane.b32.xlu1 %v987_v49, %s3614_s12 }
 0xa74   :  { %v3856_v51 = vpop.xlane.xlu1 %808 }
 0xa75   :  { %vm819_vm10 = vcmp.eq.f32.partialorder %v3850_v42, %v3856_v51 }
 0xa76   :  { %v820_v52 = vsel %vm819_vm10, %v3688_v2, 8 }
 0xa77   :  { %v821_v53 = vsel %vm85_vm2, %v820_v52, 2147483647 }
 0xa78   :  { %v823_v54 = vshra.s32 %v821_v53, 16  ;;  %v822_v56 = vand.u32 65535, %v821_v53  ;;  %v999_v19 = vpop.permute.xlu1 %998 }
 0xa7a   :  { %v825_v55 = vcvt.s32.f32 %v823_v54  ;;  %v824_v58 = vcvt.s32.f32 %v822_v56 }
 0xa7c   :  { %826 = vmin.xlane.f32.xlu0 %v825_v55 }
 0xb05   :  { %v827_v57 = vpop.xlane.xlu0 %826 }
 0xb06   :  { %vm828_vm11 = vcmp.eq.f32.partialorder %v825_v55, %v827_v57  ;;  %v833_v60 = vcvt.f32.s32 %v827_v57 }
 0xb07   :  { %v829_v59 = vsel %vm828_vm11, %v824_v58, inf }
 0xb08   :  { %830 = vmin.xlane.f32.xlu0 %v829_v59  ;;  %v834_v62 = vshll.u32 %v833_v60, 16 }
 0xb91   :  { %v831_v61 = vpop.xlane.xlu0 %830 }
 0xb92   :  { %v832_v63 = vcvt.f32.s32 %v831_v61 }
 0xb94   :  { %v3862_v3 = vadd.s32 %v834_v62, %v832_v63 }
 0xb96   :  { %vm836_vm12 = vcmp.ne.s32.totalorder %v3862_v3, 0 }
 0xb97   :  { %v3869_v7 = vsel %vm836_vm12, %v3862_v3, %v3805_v0 }
 0xb98   :  { %vm842_vm13 = vcmp.eq.s32.totalorder %v3688_v2, %v3869_v7 }
 0xb99   :  { %v3087_v9 = vsel %vm842_vm13, 1.0, %v3612_v1  ;;  %vm1573_vm13 = vcmp.eq.s32.totalorder %v3688_v2, 3 }
 0xb9a   :  { %3266 = vmatmul.mubr.msk.f32.vlgmr.msra.gmra.mxu0 %vm85_vm2, %v3087_v9 }
 0xb9b   :  { %3276 = vmatpush3.msra.mxu0 %v3732_v24  ;;  %3279 = vmatprep.mubr.msk.f32.mxu0 %vm3613_vm0, %v3612_v1 }
 0xb9c   :  { %3277 = vmatprep.subr.mxu0 %v3612_v1 }
 0xb9d   :  { %3278 = vmatpush3.msra.mxu0 %v3740_v26 }
 0xb9e   :  { %3289 = vmatprep.subr.mxu0 %v3612_v1 }
 0xc5a   :  { %v914_v10 = vpop.f32.mrf.mxu0 }
 0xc5b   :  { %v915_v11 = vadd.f32 %v3725_v13, %v914_v10 }
 0xc5c   :  { %v3267_v12 = vpop.f32.mrf.mxu0 }
 0xc5d   :  { %v990_v14 = vadd.f32 %v987_v49, %v915_v11 }
 0xc5f   :  { %v3090_v15 = vmul.f32 -1.442695, %v990_v14  ;;  %v471_v14 = vsel %vm74_vm1, %v3805_v0, 0 }
 0xc61   :  { %3442 = vpow2.f32 %v3090_v15 }
 0xc6e   :  { %v3443_v16 = vpop.eup %3442 }
 0xc6f   :  { %v994_v17 = vadd.f32 1.0, %v3443_v16  ;;  %v838_v16 = vsel %vm837_vm5, %v3862_v3, %v471_v14 }
 0xc71   :  { %3444 = vrcp.f32 %v994_v17 }
 0xc7e   :  { %v3445_v18 = vpop.eup %3444 }
 0xc7f   :  { %v1001_v20 = vmul.f32 %v3445_v18, %v999_v19  ;;  %v1008_v25 = vsub.f32 1.0, %v3445_v18  ;;  %v1014_v28 = vmul.f32 %v3445_v18, %v3825_v29 }
 0xc81   :  { %1003 = vrot.lane.b32.xlu0 %v1001_v20, %s3615_s15 }
 0xcf3   :  { %v1004_v21 = vpop.permute.xlu0 %1003 }
 0xcf4   :  { %v1006_v22 = vadd.f32 %v1004_v21, %v915_v11 }
 0xcf6   :  { %3446 = vtanh.f32 %v1006_v22 }
 0xd03   :  { %v3447_v23 = vpop.eup %3446 }
 0xd04   :  { %1010 = vrot.lane.b32.xlu1 %v3447_v23, %s3616_s18 }
 0xd76   :  { %v1011_v27 = vpop.permute.xlu1 %1010 }
 0xd77   :  { %v1013_v30 = vmul.f32 %v1011_v27, %v1008_v25 }
 0xd79   :  { %v1015_v32 = vadd.f32 %v1014_v28, %v1013_v30 }
 0xd7b   :  { %v3888_v33 = vsel %vm836_vm12, %v1015_v32, %v3825_v29 }
 0xd7c   :  { %1022 = vrot.lane.b32.xlu1 %v3888_v33, %s3616_s18 }
 0xdee   :  { %v1023_v38 = vpop.permute.xlu1 %1022 }
 0xdef   :  { %v1025_v31 = vadd.f32 %v1023_v38, %v1020_v34 }
 0xdf1   :  { %3280 = vmatmul.mubr.msk.f32.vlgmr.msra.gmra.mxu0 %vm168_vm3, %v1025_v31 }
 0xdf2   :  { %3290 = vmatpush3.msra.mxu0 %v3699_v5  ;;  %3291 = vmatprep.mubr.msk.f32.mxu0 %vm3613_vm0, %v3612_v1 }
 0xdf3   :  { %3301 = vmatprep.subr.mxu0 %v3612_v1 }
 0xeb1   :  { %v1095_v39 = vpop.f32.mrf.mxu0 }
 0xeb2   :  { %v1096_v40 = vadd.f32 %v3770_v37, %v1095_v39 }
 0xeb3   :  { %v3281_v29 = vpop.f32.mrf.mxu0 }
 0xeb4   :  { %vm1099_vm14 = vcmp.ge.f32.partialorder %v1096_v40, 0.0  ;;  %v1100_v41 = vmul.f32 0.01, %v1096_v40 }
 0xeb6   :  { %v1101_v44 = vsel %vm1099_vm14, %v1096_v40, %v1100_v41 }
 0xeb7   :  { %3287 = vmatmul.mubr.msk.f32.vlgmr.msra.gmra.mxu1 %vm168_vm3, %v1101_v44 }
 0xeb8   :  { %3295 = vmatpush3.msra.mxu1 %v3697_v4  ;;  %3298 = vmatprep.mubr.msk.f32.mxu1 %vm3613_vm0, %v3612_v1 }
 0xeb9   :  { %3296 = vmatprep.subr.mxu1 %v3612_v1 }
 0xeba   :  { %3297 = vmatpush3.msra.mxu1 %v3704_v6 }
 0xebb   :  { %3299 = vmatmul.mubr.msk.f32.vlgmr.msra.gmra.mxu1 %vm168_vm3, %v1023_v38  ;;  %3308 = vmatprep.subr.mxu1 %v3612_v1 }
 0xebc   :  { %3309 = vmatpush3.msra.mxu1 %v3756_v35  ;;  %3312 = vmatprep.mubr.msk.f32.mxu1 %vm3613_vm0, %v3612_v1 }
 0xebd   :  { %3310 = vmatprep.subr.mxu1 %v3612_v1 }
 0xebe   :  { %3311 = vmatpush3.msra.mxu1 %v3763_v36 }
 0xebf   :  { %3320 = vmatprep.subr.mxu1 %v3612_v1 }
 0xf77   :  { %v1171_v46 = vpop.f32.mrf.mxu1 }
 0xf78   :  { %v3913_v47 = vadd.f32 %v3790_v43, %v1171_v46 }
 0xf79   :  { %v3288_v48 = vpop.f32.mrf.mxu1 }
 0xf7a   :  { %v1175_v49 = vsel %vm85_vm2, %v3913_v47, -inf  ;;  %v1388_v48 = vld [vmem:[#allocation2 + $0x18] sm:$0xff] }
 0xf7b   :  { %1176 = vmax.xlane.f32.xlu0 %v1175_v49  ;;  %v1354_v52 = vpop.f32.mrf.mxu1 }
 0xf7c   :  { %v1355_v63 = vadd.f32 %v3718_v8, %v1354_v52 }
 0xf7d   :  { %v3300_v53 = vpop.f32.mrf.mxu1 }
0x1004   :  { %v3917_v54 = vpop.xlane.xlu0 %1176 }
0x1005   :  { %vm1187_vm15 = vcmp.eq.f32.partialorder %v3913_v47, %v3917_v54 }
0x1006   :  { %v1188_v55 = vsel %vm1187_vm15, %v3688_v2, 8 }
0x1007   :  { %v1189_v56 = vsel %vm85_vm2, %v1188_v55, 2147483647 }
0x1008   :  { %v1191_v57 = vshra.s32 %v1189_v56, 16  ;;  %v1190_v59 = vand.u32 65535, %v1189_v56 }
0x100a   :  { %v1193_v58 = vcvt.s32.f32 %v1191_v57  ;;  %v1192_v61 = vcvt.s32.f32 %v1190_v59 }
0x100c   :  { %1194 = vmin.xlane.f32.xlu1 %v1193_v58 }
0x1095   :  { %v1195_v60 = vpop.xlane.xlu1 %1194 }
0x1096   :  { %vm1196_vm4 = vcmp.eq.f32.partialorder %v1193_v58, %v1195_v60  ;;  %v1201_v9 = vcvt.f32.s32 %v1195_v60 }
0x1097   :  { %v1197_v62 = vsel %vm1196_vm4, %v1192_v61, inf }
0x1098   :  { %1198 = vmin.xlane.f32.xlu0 %v1197_v62  ;;  %v1202_v11 = vshll.u32 %v1201_v9, 16 }
0x10ae   :  { %1366 = vrot.lane.b32.xlu0 %v1355_v63, %s3614_s12 }
0x1121   :  { %v1199_v10 = vpop.xlane.xlu0 %1198 }
0x1122   :  { %v1200_v12 = vcvt.f32.s32 %v1199_v10 }
0x1124   :  { %v3930_v15 = vadd.s32 %v1202_v11, %v1200_v12 }
0x1125   :  { %v1367_v30 = vpop.permute.xlu0 %1366 }
0x1126   :  { %vm1204_vm7 = vcmp.ne.s32.totalorder %v3930_v15, 0  ;;  %v3935_v17 = vsel %vm1205_vm6, %v3930_v15, %v838_v16 }
0x1127   :  { %v3941_v18 = vsel %vm1204_vm7, %v3930_v15, %v3869_v7 }
0x1128   :  { %vm1210_vm9 = vcmp.eq.s32.totalorder %v3688_v2, %v3941_v18 }
0x1129   :  { %v3093_v19 = vsel %vm1210_vm9, 1.0, %v3612_v1  ;;  %vm1941_vm9 = vcmp.eq.s32.totalorder %v3688_v2, 4 }
0x112a   :  { %3292 = vmatmul.mubr.msk.f32.vlgmr.msra.gmra.mxu0 %vm85_vm2, %v3093_v19 }
0x112b   :  { %3302 = vmatpush3.msra.mxu0 %v3732_v24  ;;  %3305 = vmatprep.mubr.msk.f32.mxu0 %vm3613_vm0, %v3612_v1 }
0x112c   :  { %3303 = vmatprep.subr.mxu0 %v3612_v1 }
0x112d   :  { %3304 = vmatpush3.msra.mxu0 %v3740_v26 }
0x112e   :  { %3315 = vmatprep.subr.mxu0 %v3612_v1 }
0x11ea   :  { %v1282_v7 = vpop.f32.mrf.mxu0 }
0x11eb   :  { %v1283_v20 = vadd.f32 %v3725_v13, %v1282_v7 }
0x11ec   :  { %v3293_v21 = vpop.f32.mrf.mxu0 }
0x11ed   :  { %v1358_v22 = vadd.f32 %v1355_v63, %v1283_v20 }
0x11ef   :  { %v3096_v23 = vmul.f32 -1.442695, %v1358_v22 }
0x11f1   :  { %3448 = vpow2.f32 %v3096_v23 }
0x11fe   :  { %v3449_v25 = vpop.eup %3448 }
0x11ff   :  { %v1362_v27 = vadd.f32 1.0, %v3449_v25 }
0x1201   :  { %3450 = vrcp.f32 %v1362_v27 }
0x120e   :  { %v3451_v28 = vpop.eup %3450 }
0x120f   :  { %v1369_v32 = vmul.f32 %v3451_v28, %v1367_v30  ;;  %v1376_v39 = vsub.f32 1.0, %v3451_v28  ;;  %v1382_v29 = vmul.f32 %v3451_v28, %v3888_v33 }
0x1211   :  { %1371 = vrot.lane.b32.xlu1 %v1369_v32, %s3615_s15 }
0x1283   :  { %v1372_v34 = vpop.permute.xlu1 %1371 }
0x1284   :  { %v1374_v38 = vadd.f32 %v1372_v34, %v1283_v20 }
0x1286   :  { %3452 = vtanh.f32 %v1374_v38 }
0x1293   :  { %v3453_v31 = vpop.eup %3452 }
0x1294   :  { %1378 = vrot.lane.b32.xlu1 %v3453_v31, %s3616_s18 }
0x1306   :  { %v1379_v40 = vpop.permute.xlu1 %1378 }
0x1307   :  { %v1381_v41 = vmul.f32 %v1379_v40, %v1376_v39 }
0x1309   :  { %v1383_v44 = vadd.f32 %v1382_v29, %v1381_v41 }
0x130b   :  { %v3960_v46 = vsel %vm1204_vm7, %v1383_v44, %v3888_v33 }
0x130c   :  { %1390 = vrot.lane.b32.xlu0 %v3960_v46, %s3616_s18 }
0x137e   :  { %v1391_v49 = vpop.permute.xlu0 %1390 }
0x137f   :  { %v1393_v52 = vadd.f32 %v1391_v49, %v1388_v48 }
0x1381   :  { %3306 = vmatmul.mubr.msk.f32.vlgmr.msra.gmra.mxu0 %vm168_vm3, %v1393_v52 }
0x1382   :  { %3316 = vmatpush3.msra.mxu0 %v3699_v5  ;;  %3317 = vmatprep.mubr.msk.f32.mxu0 %vm3613_vm0, %v3612_v1 }
0x1383   :  { %3327 = vmatprep.subr.mxu0 %v3612_v1 }
0x1441   :  { %v1463_v53 = vpop.f32.mrf.mxu0 }
0x1442   :  { %v1464_v55 = vadd.f32 %v3770_v37, %v1463_v53 }
0x1443   :  { %v3307_v33 = vpop.f32.mrf.mxu0 }
0x1444   :  { %vm1467_vm1 = vcmp.ge.f32.partialorder %v1464_v55, 0.0  ;;  %v1468_v56 = vmul.f32 0.01, %v1464_v55 }
0x1446   :  { %v1469_v57 = vsel %vm1467_vm1, %v1464_v55, %v1468_v56 }
0x1447   :  { %3313 = vmatmul.mubr.msk.f32.vlgmr.msra.gmra.mxu1 %vm168_vm3, %v1469_v57 }
0x1448   :  { %3321 = vmatpush3.msra.mxu1 %v3697_v4  ;;  %3324 = vmatprep.mubr.msk.f32.mxu1 %vm3613_vm0, %v3612_v1 }
0x1449   :  { %3322 = vmatprep.subr.mxu1 %v3612_v1 }
0x144a   :  { %3323 = vmatpush3.msra.mxu1 %v3704_v6 }
0x144b   :  { %3325 = vmatmul.mubr.msk.f32.vlgmr.msra.gmra.mxu1 %vm168_vm3, %v1391_v49  ;;  %3334 = vmatprep.subr.mxu1 %v3612_v1 }
0x144c   :  { %3335 = vmatpush3.msra.mxu1 %v3756_v35  ;;  %3338 = vmatprep.mubr.msk.f32.mxu1 %vm3613_vm0, %v3612_v1 }
0x144d   :  { %3336 = vmatprep.subr.mxu1 %v3612_v1 }
0x144e   :  { %3337 = vmatpush3.msra.mxu1 %v3763_v36 }
0x144f   :  { %3346 = vmatprep.subr.mxu1 %v3612_v1 }
0x1507   :  { %v1539_v58 = vpop.f32.mrf.mxu1 }
0x1508   :  { %v3985_v59 = vadd.f32 %v3790_v43, %v1539_v58 }
0x1509   :  { %v3314_v60 = vpop.f32.mrf.mxu1 }
0x150a   :  { %v1543_v61 = vsel %vm85_vm2, %v3985_v59, -inf }
0x150b   :  { %1544 = vmax.xlane.f32.xlu1 %v1543_v61  ;;  %v1722_v62 = vpop.f32.mrf.mxu1  ;;  %v1756_v61 = vld [vmem:[#allocation2 + $0x20] sm:$0xff] }
0x150c   :  { %v1723_v9 = vadd.f32 %v3718_v8, %v1722_v62 }
0x150d   :  { %v3326_v63 = vpop.f32.mrf.mxu1 }
0x151c   :  { %1734 = vrot.lane.b32.xlu1 %v1723_v9, %s3614_s12 }
0x1594   :  { %v3991_v10 = vpop.xlane.xlu1 %1544 }
0x1595   :  { %vm1555_vm10 = vcmp.eq.f32.partialorder %v3985_v59, %v3991_v10 }
0x1596   :  { %v1556_v11 = vsel %vm1555_vm10, %v3688_v2, 8 }
0x1597   :  { %v1557_v12 = vsel %vm85_vm2, %v1556_v11, 2147483647 }
0x1598   :  { %v1559_v14 = vshra.s32 %v1557_v12, 16  ;;  %v1558_v19 = vand.u32 65535, %v1557_v12  ;;  %v1735_v44 = vpop.permute.xlu1 %1734 }
0x159a   :  { %v1561_v16 = vcvt.s32.f32 %v1559_v14  ;;  %v1560_v20 = vcvt.s32.f32 %v1558_v19 }
0x159c   :  { %1562 = vmin.xlane.f32.xlu0 %v1561_v16 }
0x1625   :  { %v1563_v7 = vpop.xlane.xlu0 %1562 }
0x1626   :  { %vm1564_vm11 = vcmp.eq.f32.partialorder %v1561_v16, %v1563_v7  ;;  %v1569_v22 = vcvt.f32.s32 %v1563_v7 }
0x1627   :  { %v1565_v21 = vsel %vm1564_vm11, %v1560_v20, inf }
0x1628   :  { %1566 = vmin.xlane.f32.xlu0 %v1565_v21  ;;  %v1570_v25 = vshll.u32 %v1569_v22, 16 }
0x16b1   :  { %v1567_v23 = vpop.xlane.xlu0 %1566 }
0x16b2   :  { %v1568_v27 = vcvt.f32.s32 %v1567_v23 }
0x16b4   :  { %v3998_v28 = vadd.s32 %v1570_v25, %v1568_v27 }
0x16b6   :  { %vm1572_vm14 = vcmp.ne.s32.totalorder %v3998_v28, 0  ;;  %v4003_v30 = vsel %vm1573_vm13, %v3998_v28, %v3935_v17 }
0x16b7   :  { %v4009_v32 = vsel %vm1572_vm14, %v3998_v28, %v3941_v18 }
0x16b8   :  { %vm1578_vm15 = vcmp.eq.s32.totalorder %v3688_v2, %v4009_v32 }
0x16b9   :  { %v3099_v34 = vsel %vm1578_vm15, 1.0, %v3612_v1 }
0x16ba   :  { %3318 = vmatmul.mubr.msk.f32.vlgmr.msra.gmra.mxu0 %vm85_vm2, %v3099_v34 }
0x16bb   :  { %3328 = vmatpush3.msra.mxu0 %v3732_v24  ;;  %3331 = vmatprep.mubr.msk.f32.mxu0 %vm3613_vm0, %v3612_v1 }
0x16bc   :  { %3329 = vmatprep.subr.mxu0 %v3612_v1 }
0x16bd   :  { %3330 = vmatpush3.msra.mxu0 %v3740_v26 }
0x16be   :  { %3341 = vmatprep.subr.mxu0 %v3612_v1 }
0x177a   :  { %v1650_v17 = vpop.f32.mrf.mxu0 }
0x177b   :  { %v1651_v18 = vadd.f32 %v3725_v13, %v1650_v17 }
0x177c   :  { %v3319_v38 = vpop.f32.mrf.mxu0 }
0x177d   :  { %v1726_v31 = vadd.f32 %v1723_v9, %v1651_v18 }
0x177f   :  { %v3102_v39 = vmul.f32 -1.442695, %v1726_v31 }
0x1781   :  { %3454 = vpow2.f32 %v3102_v39 }
0x178e   :  { %v3455_v40 = vpop.eup %3454 }
0x178f   :  { %v1730_v29 = vadd.f32 1.0, %v3455_v40 }
0x1791   :  { %3456 = vrcp.f32 %v1730_v29 }
0x179e   :  { %v3457_v41 = vpop.eup %3456 }
0x179f   :  { %v1737_v48 = vmul.f32 %v3457_v41, %v1735_v44  ;;  %v1744_v55 = vsub.f32 1.0, %v3457_v41  ;;  %v1750_v56 = vmul.f32 %v3457_v41, %v3960_v46 }
0x17a1   :  { %1739 = vrot.lane.b32.xlu0 %v1737_v48, %s3615_s15 }
0x1813   :  { %v1740_v49 = vpop.permute.xlu0 %1739 }
0x1814   :  { %v1742_v52 = vadd.f32 %v1740_v49, %v1651_v18 }
0x1816   :  { %3458 = vtanh.f32 %v1742_v52 }
0x1823   :  { %v3459_v53 = vpop.eup %3458 }
0x1824   :  { %1746 = vrot.lane.b32.xlu1 %v3459_v53, %s3616_s18 }
0x1896   :  { %v1747_v33 = vpop.permute.xlu1 %1746 }
0x1897   :  { %v1749_v57 = vmul.f32 %v1747_v33, %v1744_v55 }
0x1899   :  { %v1751_v58 = vadd.f32 %v1750_v56, %v1749_v57 }
0x189b   :  { %v4028_v60 = vsel %vm1572_vm14, %v1751_v58, %v3960_v46 }
0x189c   :  { %1758 = vrot.lane.b32.xlu1 %v4028_v60, %s3616_s18 }
0x190e   :  { %v1759_v62 = vpop.permute.xlu1 %1758 }
0x190f   :  { %v1761_v63 = vadd.f32 %v1759_v62, %v1756_v61 }
0x1911   :  { %3332 = vmatmul.mubr.msk.f32.vlgmr.msra.gmra.mxu0 %vm168_vm3, %v1761_v63 }
0x1912   :  { %3342 = vmatpush3.msra.mxu0 %v3699_v5  ;;  %3343 = vmatprep.mubr.msk.f32.mxu0 %vm3613_vm0, %v3612_v1 }
0x1913   :  { %3353 = vmatprep.subr.mxu0 %v3612_v1 }
0x19d1   :  { %v1831_v9 = vpop.f32.mrf.mxu0 }
0x19d2   :  { %v1832_v11 = vadd.f32 %v3770_v37, %v1831_v9 }
0x19d3   :  { %v3333_v46 = vpop.f32.mrf.mxu0 }
0x19d4   :  { %vm1835_vm4 = vcmp.ge.f32.partialorder %v1832_v11, 0.0  ;;  %v1836_v12 = vmul.f32 0.01, %v1832_v11 }
0x19d6   :  { %v1837_v14 = vsel %vm1835_vm4, %v1832_v11, %v1836_v12  ;;  %vm2309_vm4 = vcmp.eq.s32.totalorder %v3688_v2, 5 }
0x19d7   :  { %3339 = vmatmul.mubr.msk.f32.vlgmr.msra.gmra.mxu1 %vm168_vm3, %v1837_v14  ;;  %v2124_v14 = vld [vmem:[#allocation2 + $0x28] sm:$0xff] }
0x19d8   :  { %3347 = vmatpush3.msra.mxu1 %v3697_v4  ;;  %3350 = vmatprep.mubr.msk.f32.mxu1 %vm3613_vm0, %v3612_v1 }
0x19d9   :  { %3348 = vmatprep.subr.mxu1 %v3612_v1 }
0x19da   :  { %3349 = vmatpush3.msra.mxu1 %v3704_v6 }
0x19db   :  { %3351 = vmatmul.mubr.msk.f32.vlgmr.msra.gmra.mxu1 %vm168_vm3, %v1759_v62  ;;  %3360 = vmatprep.subr.mxu1 %v3612_v1 }
0x19dc   :  { %3361 = vmatpush3.msra.mxu1 %v3756_v35  ;;  %3364 = vmatprep.mubr.msk.f32.mxu1 %vm3613_vm0, %v3612_v1 }
0x19dd   :  { %3362 = vmatprep.subr.mxu1 %v3612_v1 }
0x19de   :  { %3363 = vmatpush3.msra.mxu1 %v3763_v36 }
0x19df   :  { %3372 = vmatprep.subr.mxu1 %v3612_v1 }
0x1a97   :  { %v1907_v4 = vpop.f32.mrf.mxu1 }
0x1a98   :  { %v4053_v16 = vadd.f32 %v3790_v43, %v1907_v4 }
0x1a99   :  { %v3340_v6 = vpop.f32.mrf.mxu1 }
0x1a9a   :  { %v1911_v19 = vsel %vm85_vm2, %v4053_v16, -inf }
0x1a9b   :  { %1912 = vmax.xlane.f32.xlu0 %v1911_v19  ;;  %v2090_v7 = vpop.f32.mrf.mxu1 }
0x1a9c   :  { %v2091_v31 = vadd.f32 %v3718_v8, %v2090_v7 }
0x1a9d   :  { %v3352_v20 = vpop.f32.mrf.mxu1 }
0x1b24   :  { %v4057_v21 = vpop.xlane.xlu0 %1912 }
0x1b25   :  { %vm1923_vm5 = vcmp.eq.f32.partialorder %v4053_v16, %v4057_v21 }
0x1b26   :  { %v1924_v22 = vsel %vm1923_vm5, %v3688_v2, 8 }
0x1b27   :  { %v1925_v23 = vsel %vm85_vm2, %v1924_v22, 2147483647 }
0x1b28   :  { %v1927_v25 = vshra.s32 %v1925_v23, 16  ;;  %v1926_v34 = vand.u32 65535, %v1925_v23  ;;  %v4110_v23 = vld [vmem:[%s4323_s3 + $0x8] sm:$0xff] }
0x1b2a   :  { %v1929_v27 = vcvt.s32.f32 %v1927_v25  ;;  %v1928_v18 = vcvt.s32.f32 %v1926_v34 }
0x1b2c   :  { %1930 = vmin.xlane.f32.xlu1 %v1929_v27 }
0x1bb5   :  { %v1931_v17 = vpop.xlane.xlu1 %1930 }
0x1bb6   :  { %vm1932_vm6 = vcmp.eq.f32.partialorder %v1929_v27, %v1931_v17  ;;  %v1937_v39 = vcvt.f32.s32 %v1931_v17 }
0x1bb7   :  { %v1933_v38 = vsel %vm1932_vm6, %v1928_v18, inf  ;;  %v4135_v18 = vld [vmem:[#allocation7] ss:$0 sm:$0xff] }
0x1bb8   :  { %1934 = vmin.xlane.f32.xlu0 %v1933_v38  ;;  %v1938_v29 = vshll.u32 %v1937_v39, 16 }
0x1bce   :  { %2102 = vrot.lane.b32.xlu0 %v2091_v31, %s3614_s12 }
0x1c41   :  { %v1935_v40 = vpop.xlane.xlu0 %1934 }
0x1c42   :  { %v1936_v41 = vcvt.f32.s32 %v1935_v40 }
0x1c44   :  { %v4066_v44 = vadd.s32 %v1938_v29, %v1936_v41 }
0x1c45   :  { %v2103_v57 = vpop.permute.xlu0 %2102 }
0x1c46   :  { %vm1940_vm1 = vcmp.ne.s32.totalorder %v4066_v44, 0  ;;  %v4071_v48 = vsel %vm1941_vm9, %v4066_v44, %v4003_v30 }
0x1c47   :  { %v4077_v8 = vsel %vm1940_vm1, %v4066_v44, %v4009_v32 }
0x1c48   :  { %vm1946_vm10 = vcmp.eq.s32.totalorder %v3688_v2, %v4077_v8 }
0x1c49   :  { %v3105_v49 = vsel %vm1946_vm10, 1.0, %v3612_v1 }
0x1c4a   :  { %3344 = vmatmul.mubr.msk.f32.vlgmr.msra.gmra.mxu0 %vm85_vm2, %v3105_v49 }
0x1c4b   :  { %3354 = vmatpush3.msra.mxu0 %v3732_v24  ;;  %3357 = vmatprep.mubr.msk.f32.mxu0 %vm3613_vm0, %v3612_v1 }
0x1c4c   :  { %3355 = vmatprep.subr.mxu0 %v3612_v1 }
0x1c4d   :  { %3356 = vmatpush3.msra.mxu0 %v3740_v26 }
0x1c4e   :  { %3367 = vmatprep.subr.mxu0 %v3612_v1 }
0x1d0a   :  { %v2018_v30 = vpop.f32.mrf.mxu0 }
0x1d0b   :  { %v2019_v32 = vadd.f32 %v3725_v13, %v2018_v30 }
0x1d0c   :  { %v3345_v52 = vpop.f32.mrf.mxu0 }
0x1d0d   :  { %v2094_v53 = vadd.f32 %v2091_v31, %v2019_v32 }
0x1d0f   :  { %v3108_v55 = vmul.f32 -1.442695, %v2094_v53 }
0x1d11   :  { %3460 = vpow2.f32 %v3108_v55 }
0x1d1e   :  { %v3461_v33 = vpop.eup %3460 }
0x1d1f   :  { %v2098_v56 = vadd.f32 1.0, %v3461_v33 }
0x1d21   :  { %3462 = vrcp.f32 %v2098_v56 }
0x1d2e   :  { %v3463_v24 = vpop.eup %3462 }
0x1d2f   :  { %v2105_v58 = vmul.f32 %v3463_v24, %v2103_v57  ;;  %v2112_v63 = vsub.f32 1.0, %v3463_v24  ;;  %v2118_v9 = vmul.f32 %v3463_v24, %v4028_v60 }
0x1d31   :  { %2107 = vrot.lane.b32.xlu1 %v2105_v58, %s3615_s15  ;;  %v4166_v58 = vld [vmem:[%s4325_s5 + $0x8] sm:$0xff] }
0x1da3   :  { %v2108_v61 = vpop.permute.xlu1 %2107 }
0x1da4   :  { %v2110_v62 = vadd.f32 %v2108_v61, %v2019_v32  ;;  %v4182_v61 = vld [vmem:[%s4322_s2] ss:$0 sm:$0xff] }
0x1da6   :  { %3464 = vtanh.f32 %v2110_v62 }
0x1db3   :  { %v3465_v26 = vpop.eup %3464 }
0x1db4   :  { %2114 = vrot.lane.b32.xlu1 %v3465_v26, %s3616_s18 }
0x1e26   :  { %v2115_v13 = vpop.permute.xlu1 %2114 }
0x1e27   :  { %v2117_v11 = vmul.f32 %v2115_v13, %v2112_v63 }
0x1e29   :  { %v2119_v46 = vadd.f32 %v2118_v9, %v2117_v11 }
0x1e2b   :  { %v4096_v12 = vsel %vm1940_vm1, %v2119_v46, %v4028_v60 }
0x1e2c   :  { %2126 = vrot.lane.b32.xlu0 %v4096_v12, %s3616_s18 }
0x1e9e   :  { %v2127_v4 = vpop.permute.xlu0 %2126 }
0x1e9f   :  { %v2129_v6 = vadd.f32 %v2127_v4, %v2124_v14 }
0x1ea1   :  { %3358 = vmatmul.mubr.msk.f32.vlgmr.msra.gmra.mxu0 %vm168_vm3, %v2129_v6 }
0x1ea2   :  { %3368 = vmatpush3.msra.mxu0 %v3699_v5  ;;  %3369 = vmatprep.mubr.msk.f32.mxu0 %vm3613_vm0, %v3612_v1  ;;  %v4119_v5 = vld [vmem:[%s4323_s3] sm:$0xff] }
0x1ea3   :  { %3379 = vmatprep.subr.mxu0 %v3612_v1 }
0x1f61   :  { %v2199_v19 = vpop.f32.mrf.mxu0 }
0x1f62   :  { %v2200_v7 = vadd.f32 %v3770_v37, %v2199_v19 }
0x1f63   :  { %v3359_v60 = vpop.f32.mrf.mxu0 }
0x1f64   :  { %vm2203_vm11 = vcmp.ge.f32.partialorder %v2200_v7, 0.0  ;;  %v2204_v20 = vmul.f32 0.01, %v2200_v7 }
0x1f66   :  { %v2205_v22 = vsel %vm2203_vm11, %v2200_v7, %v2204_v20 }
0x1f67   :  { %3365 = vmatmul.mubr.msk.f32.vlgmr.msra.gmra.mxu1 %vm168_vm3, %v2205_v22 }
0x1f68   :  { %3373 = vmatpush3.msra.mxu1 %v4110_v23  ;;  %3376 = vmatprep.mubr.msk.f32.mxu1 %vm3613_vm0, %v3612_v1 }
0x1f69   :  { %3374 = vmatprep.subr.mxu1 %v3612_v1 }
0x1f6a   :  { %3375 = vmatpush3.msra.mxu1 %v4119_v5 }
0x1f6b   :  { %3377 = vmatmul.mubr.msk.f32.vlgmr.msra.gmra.mxu1 %vm168_vm3, %v2127_v4  ;;  %3386 = vmatprep.subr.mxu1 %v3612_v1 }
0x1f6c   :  { %3387 = vmatpush3.msra.mxu1 %v3756_v35  ;;  %3390 = vmatprep.mubr.msk.f32.mxu1 %vm3613_vm0, %v3612_v1 }
0x1f6d   :  { %3388 = vmatprep.subr.mxu1 %v3612_v1 }
0x1f6e   :  { %3389 = vmatpush3.msra.mxu1 %v3763_v36 }
0x1f6f   :  { %3398 = vmatprep.subr.mxu1 %v3612_v1 }
0x2027   :  { %v2275_v37 = vpop.f32.mrf.mxu1 }
0x2028   :  { %v4131_v25 = vadd.f32 %v3790_v43, %v2275_v37 }
0x2029   :  { %v3366_v27 = vpop.f32.mrf.mxu1 }
0x202a   :  { %v2279_v34 = vsel %vm85_vm2, %v4131_v25, -inf }
0x202b   :  { %2280 = vmax.xlane.f32.xlu1 %v2279_v34  ;;  %v2458_v17 = vpop.f32.mrf.mxu1 }
0x202c   :  { %v2459_v38 = vadd.f32 %v4135_v18, %v2458_v17  ;;  %v2492_v17 = vld [vmem:[#allocation2 + $0x30] sm:$0xff] }
0x202d   :  { %v3378_v35 = vpop.f32.mrf.mxu1 }
0x203c   :  { %2470 = vrot.lane.b32.xlu1 %v2459_v38, %s3614_s12 }
0x20b4   :  { %v4139_v36 = vpop.xlane.xlu1 %2280 }
0x20b5   :  { %vm2291_vm13 = vcmp.eq.f32.partialorder %v4131_v25, %v4139_v36 }
0x20b6   :  { %v2292_v43 = vsel %vm2291_vm13, %v3688_v2, 8  ;;  %vm2677_vm13 = vcmp.eq.s32.totalorder %v3688_v2, 6 }
0x20b7   :  { %v2293_v31 = vsel %vm85_vm2, %v2292_v43, 2147483647  ;;  %v3516_v43 = vld [vmem:[#allocation5] sm:$0xff] }
0x20b8   :  { %v2295_v39 = vshra.s32 %v2293_v31, 16  ;;  %v2294_v29 = vand.u32 65535, %v2293_v31  ;;  %v2471_v14 = vpop.permute.xlu1 %2470 }
0x20ba   :  { %v2297_v40 = vcvt.s32.f32 %v2295_v39  ;;  %v2296_v49 = vcvt.s32.f32 %v2294_v29 }
0x20bc   :  { %2298 = vmin.xlane.f32.xlu0 %v2297_v40 }
0x2145   :  { %v2299_v41 = vpop.xlane.xlu0 %2298 }
0x2146   :  { %vm2300_vm15 = vcmp.eq.f32.partialorder %v2297_v40, %v2299_v41  ;;  %v2305_v32 = vcvt.f32.s32 %v2299_v41 }
0x2147   :  { %v2301_v30 = vsel %vm2300_vm15, %v2296_v49, inf  ;;  %v3518_v49 = vld [vmem:[%s4327_s7 + $0x8] sm:$0xff] }
0x2148   :  { %2302 = vmin.xlane.f32.xlu0 %v2301_v30  ;;  %v2306_v53 = vshll.u32 %v2305_v32, 16  ;;  %v4225_v30 = vld [vmem:[%s4328_s8] ss:$0 sm:$0xff] }
0x21d1   :  { %v2303_v52 = vpop.xlane.xlu0 %2302 }
0x21d2   :  { %v2304_v55 = vcvt.f32.s32 %v2303_v52 }
0x21d4   :  { %v4146_v33 = vadd.s32 %v2306_v53, %v2304_v55 }
0x21d6   :  { %vm2308_vm5 = vcmp.ne.s32.totalorder %v4146_v33, 0  ;;  %v4151_v56 = vsel %vm2309_vm4, %v4146_v33, %v4071_v48  ;;  %v4175_v48 = vld [vmem:[%s4325_s5] sm:$0xff] }
0x21d7   :  { %v4157_v24 = vsel %vm2308_vm5, %v4146_v33, %v4077_v8 }
0x21d8   :  { %vm2314_vm6 = vcmp.eq.s32.totalorder %v3688_v2, %v4157_v24 }
0x21d9   :  { %v3111_v57 = vsel %vm2314_vm6, 1.0, %v3612_v1 }
0x21da   :  { %3370 = vmatmul.mubr.msk.f32.vlgmr.msra.gmra.mxu0 %vm85_vm2, %v3111_v57 }
0x21db   :  { %3380 = vmatpush3.msra.mxu0 %v4166_v58  ;;  %3383 = vmatprep.mubr.msk.f32.mxu0 %vm3613_vm0, %v3612_v1 }
0x21dc   :  { %3381 = vmatprep.subr.mxu0 %v3612_v1 }
0x21dd   :  { %3382 = vmatpush3.msra.mxu0 %v4175_v48 }
0x21de   :  { %3393 = vmatprep.subr.mxu0 %v3612_v1 }
0x229a   :  { %v2386_v8 = vpop.f32.mrf.mxu0 }
0x229b   :  { %v2387_v62 = vadd.f32 %v4182_v61, %v2386_v8 }
0x229c   :  { %v3371_v26 = vpop.f32.mrf.mxu0 }
0x229d   :  { %v2462_v63 = vadd.f32 %v2459_v38, %v2387_v62 }
0x229f   :  { %v3114_v13 = vmul.f32 -1.442695, %v2462_v63 }
0x22a1   :  { %3466 = vpow2.f32 %v3114_v13 }
0x22ae   :  { %v3467_v9 = vpop.eup %3466 }
0x22af   :  { %v2466_v11 = vadd.f32 1.0, %v3467_v9 }
0x22b1   :  { %3468 = vrcp.f32 %v2466_v11 }
0x22be   :  { %v3469_v46 = vpop.eup %3468 }
0x22bf   :  { %v2473_v4 = vmul.f32 %v3469_v46, %v2471_v14  ;;  %v2480_v60 = vsub.f32 1.0, %v3469_v46  ;;  %v2486_v22 = vmul.f32 %v3469_v46, %v4096_v12 }
0x22c1   :  { %2475 = vrot.lane.b32.xlu0 %v2473_v4, %s3615_s15 }
0x2333   :  { %v2476_v6 = vpop.permute.xlu0 %2475 }
0x2334   :  { %v2478_v19 = vadd.f32 %v2476_v6, %v2387_v62 }
0x2336   :  { %3470 = vtanh.f32 %v2478_v19 }
0x2343   :  { %v3471_v7 = vpop.eup %3470 }
0x2344   :  { %2482 = vrot.lane.b32.xlu1 %v3471_v7, %s3616_s18 }
0x23b6   :  { %v2483_v20 = vpop.permute.xlu1 %2482 }
0x23b7   :  { %v2485_v37 = vmul.f32 %v2483_v20, %v2480_v60 }
0x23b9   :  { %v2487_v27 = vadd.f32 %v2486_v22, %v2485_v37 }
0x23bb   :  { %v4191_v34 = vsel %vm2308_vm5, %v2487_v27, %v4096_v12  ;;  %v4202_v12 = vld [vmem:[%s4326_s6] ss:$0 sm:$0xff] }
0x23bc   :  { %2494 = vrot.lane.b32.xlu1 %v4191_v34, %s3616_s18 }
0x242e   :  { %v2495_v35 = vpop.permute.xlu1 %2494 }
0x242f   :  { %v2497_v38 = vadd.f32 %v2495_v35, %v2492_v17 }
0x2431   :  { %3384 = vmatmul.mubr.msk.f32.vlgmr.msra.gmra.mxu0 %vm168_vm3, %v2497_v38 }
0x2432   :  { %3394 = vmatpush3.msra.mxu0 %v3516_v43  ;;  %3395 = vmatprep.mubr.msk.f32.mxu0 %vm3613_vm0, %v3612_v1 }
0x2433   :  { %3405 = vmatprep.subr.mxu0 %v3612_v1 }
0x24f1   :  { %v2567_v31 = vpop.f32.mrf.mxu0 }
0x24f2   :  { %v2568_v39 = vadd.f32 %v4202_v12, %v2567_v31 }
0x24f3   :  { %v3385_v40 = vpop.f32.mrf.mxu0 }
0x24f4   :  { %vm2571_vm9 = vcmp.ge.f32.partialorder %v2568_v39, 0.0  ;;  %v2572_v29 = vmul.f32 0.01, %v2568_v39 }
0x24f6   :  { %v2573_v41 = vsel %vm2571_vm9, %v2568_v39, %v2572_v29 }
0x24f7   :  { %3391 = vmatmul.mubr.msk.f32.vlgmr.msra.gmra.mxu1 %vm168_vm3, %v2573_v41 }
0x24f8   :  { %3399 = vmatpush3.msra.mxu1 %v4110_v23  ;;  %3402 = vmatprep.mubr.msk.f32.mxu1 %vm3613_vm0, %v3612_v1  ;;  %v3519_v23 = vld [vmem:[%s4327_s7] sm:$0xff]  ;;  %s3617_s7 = smov [#allocation8]  }
0x24f9   :  { %3400 = vmatprep.subr.mxu1 %v3612_v1  ;;  %s3058_s8 = sshll.u32 %s3617_s7, 4  ;;  %s3059_s8 = int_to_ptr.vmem [resolvable:$true] %s3058_s8 }
0x24fa   :  { %3401 = vmatpush3.msra.mxu1 %v4119_v5  ;;  %p3586_p2 = scmp.lt.s32.totalorder %s3059_s8, %s3059_s8 }
0x24fb   :  { %3403 = vmatmul.mubr.msk.f32.vlgmr.msra.gmra.mxu1 %vm168_vm3, %v2495_v35  ;;  %3412 = vmatprep.subr.mxu1 %v3612_v1 }
0x24fc   :  { %3413 = vmatpush3.msra.mxu1 %v3518_v49  ;;  %3416 = vmatprep.mubr.msk.f32.mxu1 %vm3613_vm0, %v3612_v1 }
0x24fd   :  { %3414 = vmatprep.subr.mxu1 %v3612_v1 }
0x24fe   :  { %3415 = vmatpush3.msra.mxu1 %v3519_v23 }
0x25b7   :  { %v2643_v5 = vpop.f32.mrf.mxu1 }
0x25b8   :  { %v4228_v32 = vadd.f32 %v4225_v30, %v2643_v5 }
0x25b9   :  { %v3392_v52 = vpop.f32.mrf.mxu1 }
0x25ba   :  { %v2647_v53 = vsel %vm85_vm2, %v4228_v32, -inf  ;;  %v2860_v52 = vld [vmem:[#allocation2 + $0x38] sm:$0xff] }
0x25bb   :  { %2648 = vmax.xlane.f32.xlu0 %v2647_v53  ;;  %v2826_v55 = vpop.f32.mrf.mxu1 }
0x25bc   :  { %v2827_v4 = vadd.f32 %v4135_v18, %v2826_v55 }
0x25bd   :  { %v3404_v57 = vpop.f32.mrf.mxu1 }
0x2644   :  { %v4232_v8 = vpop.xlane.xlu0 %2648 }
0x2645   :  { %vm2659_vm10 = vcmp.eq.f32.partialorder %v4228_v32, %v4232_v8 }
0x2646   :  { %v2660_v62 = vsel %vm2659_vm10, %v3688_v2, 8 }
0x2647   :  { %v2661_v26 = vsel %vm85_vm2, %v2660_v62, 2147483647 }
0x2648   :  { %v2663_v63 = vshra.s32 %v2661_v26, 16  ;;  %v2662_v9 = vand.u32 65535, %v2661_v26 }
0x264a   :  { %v2665_v13 = vcvt.s32.f32 %v2663_v63  ;;  %v2664_v46 = vcvt.s32.f32 %v2662_v9  ;;  %v810_v9 = vsub.f32 %v3850_v42, %v3856_v51 }
0x264c   :  { %2666 = vmin.xlane.f32.xlu1 %v2665_v13 }
0x26d5   :  { %v2667_v11 = vpop.xlane.xlu1 %2666 }
0x26d6   :  { %vm2668_vm11 = vcmp.eq.f32.partialorder %v2665_v13, %v2667_v11  ;;  %v2673_v6 = vcvt.f32.s32 %v2667_v11  ;;  %v1546_v11 = vsub.f32 %v3985_v59, %v3991_v10 }
0x26d7   :  { %v2669_v14 = vsel %vm2668_vm11, %v2664_v46, inf }
0x26d8   :  { %2670 = vmin.xlane.f32.xlu0 %v2669_v14  ;;  %v2674_v7 = vshll.u32 %v2673_v6, 16  ;;  %v1547_v46 = vmul.f32 1.442695, %v1546_v11  ;;  %v2282_v14 = vsub.f32 %v4131_v25, %v4139_v36  ;;  %v444_v36 = vsub.f32 %v3793_v45, %v3797_v50 }
0x26ee   :  { %2838 = vrot.lane.b32.xlu0 %v2827_v4, %s3614_s12  ;;  %s3581_s12 = scalar_lea.vmem %s3059_s8, 128 }
0x26ef   :  { %p3582_p1 = scmp.ne.s32.totalorder %s3059_s8, %s3581_s12  ;;  %p3587_p3 = scmp.lt.s32.totalorder %s3581_s12, %s3581_s12 }
0x26f1   :  { %p3588_p4 = por %p3587_p3, %p3586_p2 }
0x26f3   :  { %p3589_p5 = pnand %p3588_p4, %p3582_p1 }
0x2761   :  { %v2671_v19 = vpop.xlane.xlu0 %2670 }
0x2762   :  { %v2672_v60 = vcvt.f32.s32 %v2671_v19 }
0x2764   :  { %v4241_v20 = vadd.s32 %v2674_v7, %v2672_v60 }
0x2765   :  { %v2839_v39 = vpop.permute.xlu0 %2838 }
0x2766   :  { %vm2676_vm15 = vcmp.ne.s32.totalorder %v4241_v20, 0  ;;  %v4246_v22 = vsel %vm2677_vm13, %v4241_v20, %v4151_v56 }
0x2767   :  { %v2681_v18 = vsel %vm2676_vm15, %v4241_v20, %v4157_v24 }
0x2768   :  { %vm2682_vm4 = vcmp.eq.s32.totalorder %v3688_v2, %v2681_v18  ;;  %v1178_v18 = vsub.f32 %v3913_v47, %v3917_v54 }
0x2769   :  { %v3117_v37 = vsel %vm2682_vm4, 1.0, %v3612_v1 }
0x276a   :  { %3396 = vmatmul.mubr.msk.f32.vlgmr.msra.gmra.mxu0 %vm85_vm2, %v3117_v37  ;;  %v1179_v37 = vmul.f32 1.442695, %v1178_v18 }
0x276b   :  { %3406 = vmatpush3.msra.mxu0 %v4166_v58  ;;  %3409 = vmatprep.mubr.msk.f32.mxu0 %vm3613_vm0, %v3612_v1 }
0x276c   :  { %3407 = vmatprep.subr.mxu0 %v3612_v1 }
0x276d   :  { %3408 = vmatpush3.msra.mxu0 %v4175_v48 }
0x282a   :  { %v2754_v56 = vpop.f32.mrf.mxu0 }
0x282b   :  { %v2755_v27 = vadd.f32 %v4182_v61, %v2754_v56  ;;  %v1914_v56 = vsub.f32 %v4053_v16, %v4057_v21 }
0x282c   :  { %v3397_v17 = vpop.f32.mrf.mxu0 }
0x282d   :  { %v2830_v24 = vadd.f32 %v2827_v4, %v2755_v27  ;;  %v2650_v17 = vsub.f32 %v4228_v32, %v4232_v8 }
0x282f   :  { %v3120_v35 = vmul.f32 -1.442695, %v2830_v24  ;;  %v2651_v45 = vmul.f32 1.442695, %v2650_v17 }
0x2831   :  { %3472 = vpow2.f32 %v3120_v35 }
0x283e   :  { %v3473_v38 = vpop.eup %3472 }
0x283f   :  { %v2834_v43 = vadd.f32 1.0, %v3473_v38 }
0x2841   :  { %3474 = vrcp.f32 %v2834_v43 }
0x284e   :  { %v3475_v31 = vpop.eup %3474 }
0x284f   :  { %v2841_v58 = vmul.f32 %v3475_v31, %v2839_v39  ;;  %v2848_v48 = vsub.f32 1.0, %v3475_v31  ;;  %v2854_v41 = vmul.f32 %v3475_v31, %v4191_v34 }
0x2851   :  { %2843 = vrot.lane.b32.xlu1 %v2841_v58, %s3615_s15 }
0x28c3   :  { %v2844_v40 = vpop.permute.xlu1 %2843 }
0x28c4   :  { %v2846_v29 = vadd.f32 %v2844_v40, %v2755_v27  ;;  %v1915_v27 = vmul.f32 1.442695, %v1914_v56 }
0x28c6   :  { %3476 = vtanh.f32 %v2846_v29 }
0x28d3   :  { %v3477_v1 = vpop.eup %3476 }
0x28d4   :  { %2850 = vrot.lane.b32.xlu1 %v3477_v1, %s3616_s18 }
0x2946   :  { %v2851_v61 = vpop.permute.xlu1 %2850 }
0x2947   :  { %v2853_v49 = vmul.f32 %v2851_v61, %v2848_v48 }
0x2949   :  { %v2855_v23 = vadd.f32 %v2854_v41, %v2853_v49 }
0x294b   :  { %v2858_v5 = vsel %vm2676_vm15, %v2855_v23, %v4191_v34  ;;  %v811_v34 = vmul.f32 1.442695, %v810_v9 }
0x294c   :  { %2862 = vrot.lane.b32.xlu0 %v2858_v5, %s3616_s18 }
0x294d   :  { %3478 = vpow2.f32 %v811_v34 }
0x294e   :  { %3480 = vpow2.f32 %v1547_v46 }
0x295a   :  { %v3479_v60 = vpop.eup %3478 }
0x295b   :  { %v813_v42 = vsel %vm85_vm2, %v3479_v60, 0.0  ;;  %v3481_v51 = vpop.eup %3480 }
0x295c   :  { %v1549_v59 = vsel %vm85_vm2, %v3481_v51, 0.0 }
0x29be   :  { %v2863_v53 = vpop.permute.xlu0 %2862 }
0x29bf   :  { %v2865_v55 = vadd.f32 %v2863_v53, %v2860_v52 }
0x29c1   :  { %3410 = vmatmul.mubr.msk.f32.vlgmr.msra.gmra.mxu0 %vm168_vm3, %v2865_v55 }
0x2a81   :  { %v2935_v57 = vpop.f32.mrf.mxu0 }
0x2a82   :  { %v2936_v62 = vadd.f32 %v4202_v12, %v2935_v57  ;;  %v2283_v12 = vmul.f32 1.442695, %v2282_v14 }
0x2a83   :  { %v3411_v26 = vpop.f32.mrf.mxu0 }
0x2a84   :  { %vm2939_vm0 = vcmp.ge.f32.partialorder %v2936_v62, 0.0  ;;  %v2940_v63 = vmul.f32 0.01, %v2936_v62  ;;  %3482 = vpow2.f32 %v2283_v12 }
0x2a86   :  { %v2941_v13 = vsel %vm2939_vm0, %v2936_v62, %v2940_v63 }
0x2a87   :  { %3417 = vmatmul.mubr.msk.f32.vlgmr.msra.gmra.mxu1 %vm168_vm3, %v2941_v13 }
0x2a91   :  { %v3483_v10 = vpop.eup %3482 }
0x2a92   :  { %v2285_v25 = vsel %vm85_vm2, %v3483_v10, 0.0 }
0x2b47   :  { %v3011_v4 = vpop.f32.mrf.mxu1 }
0x2b48   :  { %v3012_v6 = vadd.f32 %v4225_v30, %v3011_v4  ;;  %v445_v30 = vmul.f32 1.442695, %v444_v36 }
0x2b49   :  { %v3418_v19 = vpop.f32.mrf.mxu1 }
0x2b4a   :  { %v3015_v7 = vsel %vm85_vm2, %v3012_v6, -inf  ;;  %3484 = vpow2.f32 %v445_v30 }
0x2b4b   :  { %3016 = vmax.xlane.f32.xlu1 %v3015_v7  ;;  %3486 = vpow2.f32 %v1179_v37 }
0x2b4c   :  { %3488 = vpow2.f32 %v1915_v27 }
0x2b4f   :  { %814 = vadd.xlane.f32.xlu1 %v813_v42 }
0x2b53   :  { %1550 = vadd.xlane.f32.xlu1 %v1549_v59 }
0x2b57   :  { %2286 = vadd.xlane.f32.xlu1 %v2285_v25  ;;  %v3485_v16 = vpop.eup %3484 }
0x2b58   :  { %v447_v21 = vsel %vm85_vm2, %v3485_v16, 0.0  ;;  %v3487_v31 = vpop.eup %3486 }
0x2b59   :  { %v1181_v32 = vsel %vm85_vm2, %v3487_v31, 0.0  ;;  %v3489_v8 = vpop.eup %3488 }
0x2b5a   :  { %v1917_v58 = vsel %vm85_vm2, %v3489_v8, 0.0 }
0x2bd4   :  { %v3017_v24 = vpop.xlane.xlu1 %3016 }
0x2bd5   :  { %v3018_v35 = vsub.f32 %v3012_v6, %v3017_v24  ;;  %vm3027_vm3 = vcmp.eq.f32.partialorder %v3012_v6, %v3017_v24 }
0x2bd6   :  { %v3028_v38 = vsel %vm3027_vm3, %v3688_v2, 8 }
0x2bd7   :  { %v3019_v50 = vmul.f32 1.442695, %v3018_v35  ;;  %v3029_v47 = vsel %vm85_vm2, %v3028_v38, 2147483647 }
0x2bd8   :  { %v3031_v54 = vshra.s32 %v3029_v47, 16  ;;  %v3030_v48 = vand.u32 65535, %v3029_v47  ;;  %v815_v5 = vpop.xlane.xlu1 %814 }
0x2bd9   :  { %3490 = vpow2.f32 %v3019_v50 }
0x2bda   :  { %v3033_v43 = vcvt.s32.f32 %v3031_v54  ;;  %3492 = vpow2.f32 %v2651_v45  ;;  %v3032_v41 = vcvt.s32.f32 %v3030_v48 }
0x2bdc   :  { %3034 = vmin.xlane.f32.xlu0 %v3033_v43  ;;  %v1551_v53 = vpop.xlane.xlu1 %1550 }
0x2be0   :  { %448 = vadd.xlane.f32.xlu0 %v447_v21  ;;  %v2287_v62 = vpop.xlane.xlu1 %2286 }
0x2be4   :  { %1182 = vadd.xlane.f32.xlu0 %v1181_v32 }
0x2be6   :  { %v3491_v39 = vpop.eup %3490 }
0x2be7   :  { %v3021_v40 = vsel %vm85_vm2, %v3491_v39, 0.0  ;;  %v3493_v29 = vpop.eup %3492 }
0x2be8   :  { %1918 = vadd.xlane.f32.xlu0 %v1917_v58  ;;  %3022 = vadd.xlane.f32.xlu1 %v3021_v40  ;;  %v2653_v1 = vsel %vm85_vm2, %v3493_v29, 0.0 }
0x2bec   :  { %2654 = vadd.xlane.f32.xlu0 %v2653_v1 }
0x2c65   :  { %v3035_v61 = vpop.xlane.xlu0 %3034 }
0x2c66   :  { %vm3036_vm6 = vcmp.eq.f32.partialorder %v3033_v43, %v3035_v61  ;;  %v3041_v15 = vcvt.f32.s32 %v3035_v61 }
0x2c67   :  { %v3037_v49 = vsel %vm3036_vm6, %v3032_v41, inf }
0x2c68   :  { %3038 = vmin.xlane.f32.xlu0 %v3037_v49  ;;  %v3042_v43 = vshll.u32 %v3041_v15, 16 }
0x2c69   :  { %v449_v23 = vpop.xlane.xlu0 %448 }
0x2c6a   :  { %3494 = vlog2.f32 %v449_v23 }
0x2c6b   :  { %3496 = vlog2.f32 %v815_v5 }
0x2c6d   :  { %v1183_v52 = vpop.xlane.xlu0 %1182 }
0x2c6e   :  { %3498 = vlog2.f32 %v1183_v52 }
0x2c6f   :  { %3500 = vlog2.f32 %v1551_v53 }
0x2c71   :  { %v1919_v55 = vpop.xlane.xlu0 %1918  ;;  %v3023_v12 = vpop.xlane.xlu1 %3022 }
0x2c72   :  { %3502 = vlog2.f32 %v1919_v55 }
0x2c73   :  { %3504 = vlog2.f32 %v2287_v62 }
0x2c75   :  { %v2655_v13 = vpop.xlane.xlu0 %2654 }
0x2c76   :  { %3506 = vlog2.f32 %v2655_v13 }
0x2c77   :  { %v3495_v57 = vpop.eup %3494  ;;  %3508 = vlog2.f32 %v3023_v12 }
0x2c78   :  { %v3497_v26 = vpop.eup %3496  ;;  %v451_v9 = vmul.f32 0.6931472, %v3495_v57 }
0x2c79   :  { %v817_v34 = vmul.f32 0.6931472, %v3497_v26 }
0x2c7a   :  { %v452_v46 = vsub.f32 0.0, %v451_v9 }
0x2c7b   :  { %v3499_v63 = vpop.eup %3498  ;;  %v818_v4 = vsub.f32 0.0, %v817_v34 }
0x2c7c   :  { %v1185_v11 = vmul.f32 0.6931472, %v3499_v63  ;;  %v3501_v14 = vpop.eup %3500  ;;  %v472_v60 = vsel %vm470_vm8, %v452_v46, 0.0  ;;  %vm3045_vm8 = vcmp.eq.s32.totalorder %v3688_v2, 7 }
0x2c7d   :  { %v1553_v7 = vmul.f32 0.6931472, %v3501_v14  ;;  %v839_v42 = vsel %vm836_vm12, %v818_v4, 0.0 }
0x2c7e   :  { %v1186_v6 = vsub.f32 0.0, %v1185_v11  ;;  %v840_v10 = vadd.f32 %v839_v42, %v472_v60 }
0x2c7f   :  { %v3503_v19 = vpop.eup %3502  ;;  %v1554_v25 = vsub.f32 0.0, %v1553_v7 }
0x2c80   :  { %v1207_v51 = vsel %vm1204_vm7, %v1186_v6, 0.0  ;;  %v1921_v59 = vmul.f32 0.6931472, %v3503_v19  ;;  %v3505_v36 = vpop.eup %3504  ;;  %vm3050_vm7 = vcmask 7168  }
0x2c81   :  { %v1208_v30 = vadd.f32 %v1207_v51, %v840_v10  ;;  %v1575_v56 = vsel %vm1572_vm14, %v1554_v25, 0.0  ;;  %v2289_v27 = vmul.f32 0.6931472, %v3505_v36 }
0x2c82   :  { %v1922_v18 = vsub.f32 0.0, %v1921_v59 }
0x2c83   :  { %v3507_v37 = vpop.eup %3506  ;;  %v1576_v0 = vadd.f32 %v1575_v56, %v1208_v30  ;;  %v2290_v24 = vsub.f32 0.0, %v2289_v27 }
0x2c84   :  { %v1943_v17 = vsel %vm1940_vm1, %v1922_v18, 0.0  ;;  %v2657_v3 = vmul.f32 0.6931472, %v3507_v37  ;;  %v3509_v35 = vpop.eup %3508 }
0x2c85   :  { %v1944_v38 = vadd.f32 %v1943_v17, %v1576_v0  ;;  %v2311_v50 = vsel %vm2308_vm5, %v2290_v24, 0.0  ;;  %v3025_v47 = vmul.f32 0.6931472, %v3509_v35 }
0x2c86   :  { %v2658_v45 = vsub.f32 0.0, %v2657_v3 }
0x2c87   :  { %v2312_v16 = vadd.f32 %v2311_v50, %v1944_v38  ;;  %v3026_v31 = vsub.f32 0.0, %v3025_v47 }
0x2c88   :  { %v2679_v44 = vsel %vm2676_vm15, %v2658_v45, 0.0 }
0x2c89   :  { %v2680_v32 = vadd.f32 %v2679_v44, %v2312_v16 }
0x2cf1   :  { %v3039_v54 = vpop.xlane.xlu0 %3038 }
0x2cf2   :  { %v3040_v28 = vcvt.f32.s32 %v3039_v54 }
0x2cf4   :  { %v3043_v21 = vadd.s32 %v3042_v43, %v3040_v28 }
0x2cf6   :  { %vm3044_vm12 = vcmp.ne.s32.totalorder %v3043_v21, 0  ;;  %v3046_v33 = vsel %vm3045_vm8, %v3043_v21, %v4246_v22 }
0x2cf7   :  { %v3047_v8 = vsel %vm3044_vm12, %v3026_v31, 0.0  ;;  %3049 = vst.msk [vmem:[#allocation8] sm:$0xff] %vm85_vm2, %v3046_v33 }
0x2cf8   :  { %v3048_v39 = vadd.f32 %v3047_v8, %v2680_v32 }
0x2cf9   :  { %3592 = shalt.err (!%p3589_p5)
}
0x2cfa   :  { %3061 = dma.vmem_to_hbm [thread:$0]  %s3059_s8, 128, %s4329_s9, [#allocation4]   ;;  %3051 = vst.msk [vmem:[%s4330_s10] sm:$0xff] %vm3050_vm7, %v3048_v39 }
0x2cfb   :  { %3605 = dma.done.wait [#allocation4], 128  }
0x2cfc   :  { %3606 = vsyncadd [#allocation4], 4294967168 }
0x2cfd   :  { %3069 = vsyncpa [#allocation3], 1 }
0x2cfe   :  { %3070 = vsyncpa [#allocation6], 1 }
0x2cff   :  { %3071 = vsyncpa [#allocation4], 1 }

</bundles_post_ra>
